<compile_context>
chip_gen: v5e
topology: v5e:2x2
jax: 0.10.0
libtpu: 0.0.40
codegen_flags: <defaults>
</compile_context>

<pallas_src>
import functools

import jax
import jax.numpy as jnp
from jax.experimental import pallas as pl
from jax.experimental.pallas import tpu as pltpu


def _round_up(x, m):
    return (x + m - 1) // m * m


def _transition_kernel(s_ref, w1_ref, b1_ref, w2_ref, b2_ref, w3_ref, b3_ref,
                       gamma_ref, beta_ref, out_ref, *, num_layers, eps, c_real):
    # bf16 tile from HBM -> f32 working precision (residual / LayerNorm in f32).
    s = s_ref[...].astype(jnp.float32)                       # (tr, c_pad)

    # Transition layers, statically unrolled (num_layers is small).
    # MXU consumes bf16 inputs with f32 accumulation; VPU math stays f32.
    for l in range(num_layers):
        s_initial = s
        x = jnp.dot(s.astype(jnp.bfloat16), w1_ref[l],
                    preferred_element_type=jnp.float32) + b1_ref[l]
        x = jnp.maximum(x, 0.0)
        x = jnp.dot(x.astype(jnp.bfloat16), w2_ref[l],
                    preferred_element_type=jnp.float32) + b2_ref[l]
        x = jnp.maximum(x, 0.0)
        x = jnp.dot(x.astype(jnp.bfloat16), w3_ref[l],
                    preferred_element_type=jnp.float32) + b3_ref[l]
        s = s_initial + x

    # TODO(synk): nn.Dropout is identity in eval mode; training-mode dropout
    # (pltpu.prng_random_bits mask) is intentionally not implemented.

    # LayerNorm over the real channel dim.  Padded channel lanes of s are
    # exactly zero (zero-padded input / weights / biases), so plain lane sums
    # divided by c_real give the correct statistics and var = E[x^2] - mean^2
    # needs no lane mask.  gamma/beta padding zeroes the padded output lanes.
    inv_c = 1.0 / c_real
    mean = jnp.sum(s, axis=-1, keepdims=True) * inv_c
    mean_sq = jnp.sum(s * s, axis=-1, keepdims=True) * inv_c
    var = jnp.maximum(mean_sq - mean * mean, 0.0)
    inv = jax.lax.rsqrt(var + eps)
    out_ref[...] = ((s - mean) * inv * gamma_ref[...]
                    + beta_ref[...]).astype(out_ref.dtype)


def prepare_params(params):
    """One-time padding / bf16 cast of the layer weights (hoisted out of the
    per-call hot path).  Weights are stored (in, out); channel padded to a
    lane-dense multiple of 128."""
    c = params["gamma"].shape[-1]
    c_pad = _round_up(c, 128)

    def pad_w(w):  # (L, c, c) -> (L, c_pad, c_pad), bf16 for the MXU
        return jnp.pad(w, ((0, 0), (0, c_pad - c), (0, c_pad - c))).astype(jnp.bfloat16)

    def pad_b(b):  # (L, 1, c) -> (L, 1, c_pad), f32
        return jnp.pad(b, ((0, 0), (0, 0), (0, c_pad - c))).astype(jnp.float32)

    return dict(
        c=c, c_pad=c_pad,
        w1=pad_w(params["w1"]), w2=pad_w(params["w2"]), w3=pad_w(params["w3"]),
        b1=pad_b(params["b1"]), b2=pad_b(params["b2"]), b3=pad_b(params["b3"]),
        gamma=jnp.pad(params["gamma"], ((0, 0), (0, c_pad - c))).astype(jnp.float32),
        beta=jnp.pad(params["beta"], ((0, 0), (0, c_pad - c))).astype(jnp.float32),
    )


def _select_tiling(n_rows, c_pad, tile_rows):
    """Balanced row tiling: big tiles (amortize ~0.35us/step), at least 2 grid
    steps when there is enough work (v7x megacore), last tile not mostly
    padding, and a VMEM budget so the tile stays legal on v5e/v7x."""
    rows8 = _round_up(max(n_rows, 8), 8)
    # ~36 bytes/row/lane: bf16 in x2 bufs, f32 out x2 bufs, ~5 f32 temporaries.
    bytes_per_row = c_pad * 36
    budget_rows = max(8, (24 * 1024 * 1024 // bytes_per_row) // 8 * 8)
    tr_cap = max(8, min(_round_up(max(tile_rows, 8), 8), budget_rows, rows8))
    n_tiles = pl.cdiv(rows8, tr_cap)
    if n_tiles < 2 and rows8 >= 16:
        n_tiles = 2                      # keep both v7x TensorCores busy
    tr = _round_up(pl.cdiv(rows8, n_tiles), 8)
    rows_pad = tr * n_tiles
    return tr, rows_pad, n_tiles


def structure_module_transition(s, prepped, *, eps=1e-5, tile_rows=1024):
    """s: [..., c] float array.  prepped: output of prepare_params()."""
    c, c_pad = prepped["c"], prepped["c_pad"]
    num_layers = prepped["w1"].shape[0]
    orig_shape = s.shape
    assert orig_shape[-1] == c
    s2 = s.reshape(-1, c)
    n_rows = s2.shape[0]

    tr, rows_pad, n_tiles = _select_tiling(n_rows, c_pad, tile_rows)

    # bf16 activation shipping (the MXU consumes bf16 anyway); padded lanes/rows
    # are zero so the LayerNorm statistics over the real c stay exact.
    s_p = jnp.pad(s2.astype(jnp.bfloat16),
                  ((0, rows_pad - n_rows), (0, c_pad - c)))

    kernel = functools.partial(_transition_kernel,
                               num_layers=num_layers, eps=eps, c_real=c)
    consts = (prepped["w1"], prepped["b1"], prepped["w2"], prepped["b2"],
              prepped["w3"], prepped["b3"], prepped["gamma"], prepped["beta"])

    row_in_spec = pl.BlockSpec((tr, c_pad), lambda i: (i, 0))
    row_out_spec = pl.BlockSpec((tr, c_pad), lambda i: (i, 0))

    def run(single_buffered):
        def weight_spec(shape):
            idx = lambda i, _n=len(shape): (0,) * _n
            if single_buffered:
                # Constant index map -> fetched once; single buffer saves VMEM.
                return pl.BlockSpec(shape, idx, pipeline_mode=pl.Buffered(buffer_count=1))
            return pl.BlockSpec(shape, idx)

        return pl.pallas_call(
            kernel,
            out_shape=jax.ShapeDtypeStruct((rows_pad, c_pad), jnp.float32),
            grid_spec=pltpu.PrefetchScalarGridSpec(
                num_scalar_prefetch=0,
                grid=(n_tiles,),
                in_specs=[row_in_spec] + [weight_spec(w.shape) for w in consts],
                out_specs=row_out_spec,
            ),
            compiler_params=pltpu.CompilerParams(
                dimension_semantics=("parallel",),
                vmem_limit_bytes=48 * 1024 * 1024),
        )(s_p, *consts)

    try:
        out_p = run(True)
    except Exception:
        # pipeline_mode / Buffered(1) not supported on this jax build: fall back.
        out_p = run(False)

    out = out_p[:n_rows, :c].astype(s.dtype)
    return out.reshape(orig_shape)


def init_params(key, c, num_layers):
    ks = jax.random.split(key, 6)
    scale = 1.0 / jnp.sqrt(c)
    # Deterministic synthetic init (shapes match the module; weights stored (in, out)).
    w1 = jax.random.normal(ks[0], (num_layers, c, c), jnp.float32) * scale
    w2 = jax.random.normal(ks[1], (num_layers, c, c), jnp.float32) * scale
    w3 = jax.random.normal(ks[2], (num_layers, c, c), jnp.float32) * scale
    b1 = jax.random.normal(ks[3], (num_layers, 1, c), jnp.float32) * 0.02
    b2 = jax.random.normal(ks[4], (num_layers, 1, c), jnp.float32) * 0.02
    b3 = jax.random.normal(ks[5], (num_layers, 1, c), jnp.float32) * 0.02
    gamma = jnp.ones((1, c), jnp.float32)
    beta = jnp.zeros((1, c), jnp.float32)
    return dict(w1=w1, b1=b1, w2=w2, b2=b2, w3=w3, b3=b3, gamma=gamma, beta=beta)


def reference(s, p, num_layers, eps=1e-5):
    """Pure-JAX reference mirroring the kernel's numerics: bf16 activation I/O,
    bf16 MXU inputs, f32 accumulation / residual / LayerNorm."""
    c = s.shape[-1]
    s = s.astype(jnp.bfloat16).astype(jnp.float32).reshape(-1, c)

    def dot(a, w):
        return jnp.dot(a.astype(jnp.bfloat16), w.astype(jnp.bfloat16),
                       preferred_element_type=jnp.float32)

    for l in range(num_layers):
        s0 = s
        x = jnp.maximum(dot(s, p["w1"][l]) + p["b1"][l], 0.0)
        x = jnp.maximum(dot(x, p["w2"][l]) + p["b2"][l], 0.0)
        x = dot(x, p["w3"][l]) + p["b3"][l]
        s = s0 + x
    mean = jnp.mean(s, -1, keepdims=True)
    var = jnp.mean((s - mean) ** 2, -1, keepdims=True)
    return (s - mean) * jax.lax.rsqrt(var + eps) * p["gamma"] + p["beta"]


def _run_case(key, batch, n_res, c, num_layers, tile_rows):
    k_s, k_p = jax.random.split(key)
    s_in = jax.random.normal(k_s, (batch, n_res, c), jnp.float32)
    params = init_params(k_p, c, num_layers)
    prepped = prepare_params(params)          # one-time, hoisted out of hot path

    out = structure_module_transition(s_in, prepped, tile_rows=tile_rows)
    jax.block_until_ready(out)

    ref = reference(s_in, params, num_layers).reshape(batch, n_res, c)
    assert jnp.allclose(out, ref, atol=2e-3, rtol=2e-3), \
        f"mismatch vs reference (c={c}, n_res={n_res})"


if __name__ == "__main__":
    key = jax.random.PRNGKey(0)
    k_a, k_b = jax.random.split(key)

    # Case A: lane-dense channel (c=128); grid forced to 2 steps (16-row tiles)
    # so the "parallel" axis can shard across v7x's TensorCores.
    _run_case(k_a, batch=2, n_res=16, c=128, num_layers=2, tile_rows=1024)

    # Case B: channel padding (48 -> 128), ragged rows (26 -> 32), 2 balanced
    # 16-row tiles, 3 stacked layers.
    _run_case(k_b, batch=2, n_res=13, c=48, num_layers=3, tile_rows=16)

    print("KERNEL_OK")
</pallas_src>

<mosaic_0001>
module attributes {stable_mosaic.version = 11 : i64} {
  func.func @_transition_kernel(%arg0: i32, %arg1: memref<16x128xbf16, #tpu.memory_space<vmem>>, %arg2: memref<2x128x128xbf16, #tpu.memory_space<vmem>>, %arg3: memref<2x1x128xf32, #tpu.memory_space<vmem>>, %arg4: memref<2x128x128xbf16, #tpu.memory_space<vmem>>, %arg5: memref<2x1x128xf32, #tpu.memory_space<vmem>>, %arg6: memref<2x128x128xbf16, #tpu.memory_space<vmem>>, %arg7: memref<2x1x128xf32, #tpu.memory_space<vmem>>, %arg8: memref<1x128xf32, #tpu.memory_space<vmem>>, %arg9: memref<1x128xf32, #tpu.memory_space<vmem>>, %arg10: memref<16x128xf32, #tpu.memory_space<vmem>>) attributes {dimension_semantics = [#tpu.dimension_semantics<parallel>], iteration_bounds = array<i64: 2>, scalar_prefetch = 0 : i64, scratch_operands = 0 : i64, tpu.core_type = #tpu.core_type<tc>, window_params = [{transform_indices = @transform_0, window_bounds = array<i64: 16, 128>}, {pipeline_mode = #tpu.pipeline_mode<synchronous>, transform_indices = @transform_1, window_bounds = array<i64: 2, 128, 128>}, {pipeline_mode = #tpu.pipeline_mode<synchronous>, transform_indices = @transform_2, window_bounds = array<i64: 2, 1, 128>}, {pipeline_mode = #tpu.pipeline_mode<synchronous>, transform_indices = @transform_3, window_bounds = array<i64: 2, 128, 128>}, {pipeline_mode = #tpu.pipeline_mode<synchronous>, transform_indices = @transform_4, window_bounds = array<i64: 2, 1, 128>}, {pipeline_mode = #tpu.pipeline_mode<synchronous>, transform_indices = @transform_5, window_bounds = array<i64: 2, 128, 128>}, {pipeline_mode = #tpu.pipeline_mode<synchronous>, transform_indices = @transform_6, window_bounds = array<i64: 2, 1, 128>}, {pipeline_mode = #tpu.pipeline_mode<synchronous>, transform_indices = @transform_7, window_bounds = array<i64: 1, 128>}, {pipeline_mode = #tpu.pipeline_mode<synchronous>, transform_indices = @transform_8, window_bounds = array<i64: 1, 128>}, {transform_indices = @transform_9, window_bounds = array<i64: 16, 128>}]} {
    %c0 = arith.constant 0 : index
    %c0_0 = arith.constant 0 : index
    %0 = vector.load %arg1[%c0, %c0_0] : memref<16x128xbf16, #tpu.memory_space<vmem>>, vector<16x128xbf16>
    %1 = arith.extf %0 : vector<16x128xbf16> to vector<16x128xf32>
    %2 = arith.truncf %1 : vector<16x128xf32> to vector<16x128xbf16>
    %c0_1 = arith.constant 0 : index
    %c0_2 = arith.constant 0 : index
    %c0_3 = arith.constant 0 : index
    %3 = vector.load %arg2[%c0_1, %c0_2, %c0_3] : memref<2x128x128xbf16, #tpu.memory_space<vmem>>, vector<1x128x128xbf16>
    %4 = vector.shape_cast %3 : vector<1x128x128xbf16> to vector<128x128xbf16>
    %cst = arith.constant dense<0.000000e+00> : vector<16x128xf32>
    %5 = tpu.matmul %2, %4, %cst {dimension_numbers = #tpu.dot_dimension_numbers<[1], [0], [0], [1], [0, 0, 1, 1], [], []>} : vector<16x128xbf16>, vector<128x128xbf16>, vector<16x128xf32> -> vector<16x128xf32>
    %c0_4 = arith.constant 0 : index
    %c0_5 = arith.constant 0 : index
    %c0_6 = arith.constant 0 : index
    %6 = vector.load %arg3[%c0_4, %c0_5, %c0_6] : memref<2x1x128xf32, #tpu.memory_space<vmem>>, vector<1x1x128xf32>
    %7 = vector.shape_cast %6 : vector<1x1x128xf32> to vector<1x128xf32>
    %8 = vector.broadcast %7 : vector<1x128xf32> to vector<16x128xf32>
    %9 = arith.addf %5, %8 : vector<16x128xf32>
    %cst_7 = arith.constant 0.000000e+00 : f32
    %10 = vector.broadcast %cst_7 : f32 to vector<16x128xf32>
    %11 = arith.maximumf %9, %10 : vector<16x128xf32>
    %12 = arith.truncf %11 : vector<16x128xf32> to vector<16x128xbf16>
    %c0_8 = arith.constant 0 : index
    %c0_9 = arith.constant 0 : index
    %c0_10 = arith.constant 0 : index
    %13 = vector.load %arg4[%c0_8, %c0_9, %c0_10] : memref<2x128x128xbf16, #tpu.memory_space<vmem>>, vector<1x128x128xbf16>
    %14 = vector.shape_cast %13 : vector<1x128x128xbf16> to vector<128x128xbf16>
    %cst_11 = arith.constant dense<0.000000e+00> : vector<16x128xf32>
    %15 = tpu.matmul %12, %14, %cst_11 {dimension_numbers = #tpu.dot_dimension_numbers<[1], [0], [0], [1], [0, 0, 1, 1], [], []>} : vector<16x128xbf16>, vector<128x128xbf16>, vector<16x128xf32> -> vector<16x128xf32>
    %c0_12 = arith.constant 0 : index
    %c0_13 = arith.constant 0 : index
    %c0_14 = arith.constant 0 : index
    %16 = vector.load %arg5[%c0_12, %c0_13, %c0_14] : memref<2x1x128xf32, #tpu.memory_space<vmem>>, vector<1x1x128xf32>
    %17 = vector.shape_cast %16 : vector<1x1x128xf32> to vector<1x128xf32>
    %18 = vector.broadcast %17 : vector<1x128xf32> to vector<16x128xf32>
    %19 = arith.addf %15, %18 : vector<16x128xf32>
    %cst_15 = arith.constant 0.000000e+00 : f32
    %20 = vector.broadcast %cst_15 : f32 to vector<16x128xf32>
    %21 = arith.maximumf %19, %20 : vector<16x128xf32>
    %22 = arith.truncf %21 : vector<16x128xf32> to vector<16x128xbf16>
    %c0_16 = arith.constant 0 : index
    %c0_17 = arith.constant 0 : index
    %c0_18 = arith.constant 0 : index
    %23 = vector.load %arg6[%c0_16, %c0_17, %c0_18] : memref<2x128x128xbf16, #tpu.memory_space<vmem>>, vector<1x128x128xbf16>
    %24 = vector.shape_cast %23 : vector<1x128x128xbf16> to vector<128x128xbf16>
    %cst_19 = arith.constant dense<0.000000e+00> : vector<16x128xf32>
    %25 = tpu.matmul %22, %24, %cst_19 {dimension_numbers = #tpu.dot_dimension_numbers<[1], [0], [0], [1], [0, 0, 1, 1], [], []>} : vector<16x128xbf16>, vector<128x128xbf16>, vector<16x128xf32> -> vector<16x128xf32>
    %c0_20 = arith.constant 0 : index
    %c0_21 = arith.constant 0 : index
    %c0_22 = arith.constant 0 : index
    %26 = vector.load %arg7[%c0_20, %c0_21, %c0_22] : memref<2x1x128xf32, #tpu.memory_space<vmem>>, vector<1x1x128xf32>
    %27 = vector.shape_cast %26 : vector<1x1x128xf32> to vector<1x128xf32>
    %28 = vector.broadcast %27 : vector<1x128xf32> to vector<16x128xf32>
    %29 = arith.addf %25, %28 : vector<16x128xf32>
    %30 = arith.addf %1, %29 : vector<16x128xf32>
    %31 = arith.truncf %30 : vector<16x128xf32> to vector<16x128xbf16>
    %c1 = arith.constant 1 : index
    %c0_23 = arith.constant 0 : index
    %c0_24 = arith.constant 0 : index
    %32 = vector.load %arg2[%c1, %c0_23, %c0_24] : memref<2x128x128xbf16, #tpu.memory_space<vmem>>, vector<1x128x128xbf16>
    %33 = vector.shape_cast %32 : vector<1x128x128xbf16> to vector<128x128xbf16>
    %cst_25 = arith.constant dense<0.000000e+00> : vector<16x128xf32>
    %34 = tpu.matmul %31, %33, %cst_25 {dimension_numbers = #tpu.dot_dimension_numbers<[1], [0], [0], [1], [0, 0, 1, 1], [], []>} : vector<16x128xbf16>, vector<128x128xbf16>, vector<16x128xf32> -> vector<16x128xf32>
    %c1_26 = arith.constant 1 : index
    %c0_27 = arith.constant 0 : index
    %c0_28 = arith.constant 0 : index
    %35 = vector.load %arg3[%c1_26, %c0_27, %c0_28] : memref<2x1x128xf32, #tpu.memory_space<vmem>>, vector<1x1x128xf32>
    %36 = vector.shape_cast %35 : vector<1x1x128xf32> to vector<1x128xf32>
    %37 = vector.broadcast %36 : vector<1x128xf32> to vector<16x128xf32>
    %38 = arith.addf %34, %37 : vector<16x128xf32>
    %cst_29 = arith.constant 0.000000e+00 : f32
    %39 = vector.broadcast %cst_29 : f32 to vector<16x128xf32>
    %40 = arith.maximumf %38, %39 : vector<16x128xf32>
    %41 = arith.truncf %40 : vector<16x128xf32> to vector<16x128xbf16>
    %c1_30 = arith.constant 1 : index
    %c0_31 = arith.constant 0 : index
    %c0_32 = arith.constant 0 : index
    %42 = vector.load %arg4[%c1_30, %c0_31, %c0_32] : memref<2x128x128xbf16, #tpu.memory_space<vmem>>, vector<1x128x128xbf16>
    %43 = vector.shape_cast %42 : vector<1x128x128xbf16> to vector<128x128xbf16>
    %cst_33 = arith.constant dense<0.000000e+00> : vector<16x128xf32>
    %44 = tpu.matmul %41, %43, %cst_33 {dimension_numbers = #tpu.dot_dimension_numbers<[1], [0], [0], [1], [0, 0, 1, 1], [], []>} : vector<16x128xbf16>, vector<128x128xbf16>, vector<16x128xf32> -> vector<16x128xf32>
    %c1_34 = arith.constant 1 : index
    %c0_35 = arith.constant 0 : index
    %c0_36 = arith.constant 0 : index
    %45 = vector.load %arg5[%c1_34, %c0_35, %c0_36] : memref<2x1x128xf32, #tpu.memory_space<vmem>>, vector<1x1x128xf32>
    %46 = vector.shape_cast %45 : vector<1x1x128xf32> to vector<1x128xf32>
    %47 = vector.broadcast %46 : vector<1x128xf32> to vector<16x128xf32>
    %48 = arith.addf %44, %47 : vector<16x128xf32>
    %cst_37 = arith.constant 0.000000e+00 : f32
    %49 = vector.broadcast %cst_37 : f32 to vector<16x128xf32>
    %50 = arith.maximumf %48, %49 : vector<16x128xf32>
    %51 = arith.truncf %50 : vector<16x128xf32> to vector<16x128xbf16>
    %c1_38 = arith.constant 1 : index
    %c0_39 = arith.constant 0 : index
    %c0_40 = arith.constant 0 : index
    %52 = vector.load %arg6[%c1_38, %c0_39, %c0_40] : memref<2x128x128xbf16, #tpu.memory_space<vmem>>, vector<1x128x128xbf16>
    %53 = vector.shape_cast %52 : vector<1x128x128xbf16> to vector<128x128xbf16>
    %cst_41 = arith.constant dense<0.000000e+00> : vector<16x128xf32>
    %54 = tpu.matmul %51, %53, %cst_41 {dimension_numbers = #tpu.dot_dimension_numbers<[1], [0], [0], [1], [0, 0, 1, 1], [], []>} : vector<16x128xbf16>, vector<128x128xbf16>, vector<16x128xf32> -> vector<16x128xf32>
    %c1_42 = arith.constant 1 : index
    %c0_43 = arith.constant 0 : index
    %c0_44 = arith.constant 0 : index
    %55 = vector.load %arg7[%c1_42, %c0_43, %c0_44] : memref<2x1x128xf32, #tpu.memory_space<vmem>>, vector<1x1x128xf32>
    %56 = vector.shape_cast %55 : vector<1x1x128xf32> to vector<1x128xf32>
    %57 = vector.broadcast %56 : vector<1x128xf32> to vector<16x128xf32>
    %58 = arith.addf %54, %57 : vector<16x128xf32>
    %59 = arith.addf %30, %58 : vector<16x128xf32>
    %cst_45 = arith.constant dense<0.000000e+00> : vector<16xf32>
    %60 = vector.multi_reduction <add>, %59, %cst_45 [1] : vector<16x128xf32> to vector<16xf32>
    %61 = vector.shape_cast %60 : vector<16xf32> to vector<16x1xf32>
    %cst_46 = arith.constant 7.812500e-03 : f32
    %62 = vector.broadcast %cst_46 : f32 to vector<16x1xf32>
    %63 = arith.mulf %61, %62 : vector<16x1xf32>
    %64 = arith.mulf %59, %59 : vector<16x128xf32>
    %cst_47 = arith.constant dense<0.000000e+00> : vector<16xf32>
    %65 = vector.multi_reduction <add>, %64, %cst_47 [1] : vector<16x128xf32> to vector<16xf32>
    %66 = vector.shape_cast %65 : vector<16xf32> to vector<16x1xf32>
    %cst_48 = arith.constant 7.812500e-03 : f32
    %67 = vector.broadcast %cst_48 : f32 to vector<16x1xf32>
    %68 = arith.mulf %66, %67 : vector<16x1xf32>
    %69 = arith.mulf %63, %63 : vector<16x1xf32>
    %70 = arith.subf %68, %69 : vector<16x1xf32>
    %cst_49 = arith.constant 0.000000e+00 : f32
    %71 = vector.broadcast %cst_49 : f32 to vector<16x1xf32>
    %72 = arith.maximumf %70, %71 : vector<16x1xf32>
    %cst_50 = arith.constant 9.99999974E-6 : f32
    %73 = vector.broadcast %cst_50 : f32 to vector<16x1xf32>
    %74 = arith.addf %72, %73 : vector<16x1xf32>
    %75 = math.rsqrt %74 : vector<16x1xf32>
    %76 = vector.broadcast %63 : vector<16x1xf32> to vector<16x128xf32>
    %77 = arith.subf %59, %76 : vector<16x128xf32>
    %78 = vector.broadcast %75 : vector<16x1xf32> to vector<16x128xf32>
    %79 = arith.mulf %77, %78 : vector<16x128xf32>
    %c0_51 = arith.constant 0 : index
    %c0_52 = arith.constant 0 : index
    %80 = vector.load %arg8[%c0_51, %c0_52] : memref<1x128xf32, #tpu.memory_space<vmem>>, vector<1x128xf32>
    %81 = vector.broadcast %80 : vector<1x128xf32> to vector<16x128xf32>
    %82 = arith.mulf %79, %81 : vector<16x128xf32>
    %c0_53 = arith.constant 0 : index
    %c0_54 = arith.constant 0 : index
    %83 = vector.load %arg9[%c0_53, %c0_54] : memref<1x128xf32, #tpu.memory_space<vmem>>, vector<1x128xf32>
    %84 = vector.broadcast %83 : vector<1x128xf32> to vector<16x128xf32>
    %85 = arith.addf %82, %84 : vector<16x128xf32>
    %c0_55 = arith.constant 0 : index
    %c0_56 = arith.constant 0 : index
    %86 = vector.load %arg10[%c0_55, %c0_56] : memref<16x128xf32, #tpu.memory_space<vmem>>, vector<16x128xf32>
    tpu.vector_store %arg10[%c0_55, %c0_56], %85 {strides = array<i32>} : memref<16x128xf32, #tpu.memory_space<vmem>>, vector<16x128xf32>,
    return
  }
  func.func @transform_0(%arg0: i32) -> (i32, i32) {
    %c0_i32 = arith.constant 0 : i32
    %c0_i32_0 = arith.constant 0 : i32
    return %arg0, %c0_i32 : i32, i32
  }
  func.func @transform_1(%arg0: i32) -> (i32, i32, i32) {
    %c0_i32 = arith.constant 0 : i32
    %c0_i32_0 = arith.constant 0 : i32
    %c0_i32_1 = arith.constant 0 : i32
    %c0_i32_2 = arith.constant 0 : i32
    return %c0_i32, %c0_i32_0, %c0_i32_1 : i32, i32, i32
  }
  func.func @transform_2(%arg0: i32) -> (i32, i32, i32) {
    %c0_i32 = arith.constant 0 : i32
    %c0_i32_0 = arith.constant 0 : i32
    %c0_i32_1 = arith.constant 0 : i32
    %c0_i32_2 = arith.constant 0 : i32
    return %c0_i32, %c0_i32_0, %c0_i32_1 : i32, i32, i32
  }
  func.func @transform_3(%arg0: i32) -> (i32, i32, i32) {
    %c0_i32 = arith.constant 0 : i32
    %c0_i32_0 = arith.constant 0 : i32
    %c0_i32_1 = arith.constant 0 : i32
    %c0_i32_2 = arith.constant 0 : i32
    return %c0_i32, %c0_i32_0, %c0_i32_1 : i32, i32, i32
  }
  func.func @transform_4(%arg0: i32) -> (i32, i32, i32) {
    %c0_i32 = arith.constant 0 : i32
    %c0_i32_0 = arith.constant 0 : i32
    %c0_i32_1 = arith.constant 0 : i32
    %c0_i32_2 = arith.constant 0 : i32
    return %c0_i32, %c0_i32_0, %c0_i32_1 : i32, i32, i32
  }
  func.func @transform_5(%arg0: i32) -> (i32, i32, i32) {
    %c0_i32 = arith.constant 0 : i32
    %c0_i32_0 = arith.constant 0 : i32
    %c0_i32_1 = arith.constant 0 : i32
    %c0_i32_2 = arith.constant 0 : i32
    return %c0_i32, %c0_i32_0, %c0_i32_1 : i32, i32, i32
  }
  func.func @transform_6(%arg0: i32) -> (i32, i32, i32) {
    %c0_i32 = arith.constant 0 : i32
    %c0_i32_0 = arith.constant 0 : i32
    %c0_i32_1 = arith.constant 0 : i32
    %c0_i32_2 = arith.constant 0 : i32
    return %c0_i32, %c0_i32_0, %c0_i32_1 : i32, i32, i32
  }
  func.func @transform_7(%arg0: i32) -> (i32, i32) {
    %c0_i32 = arith.constant 0 : i32
    %c0_i32_0 = arith.constant 0 : i32
    %c0_i32_1 = arith.constant 0 : i32
    return %c0_i32, %c0_i32_0 : i32, i32
  }
  func.func @transform_8(%arg0: i32) -> (i32, i32) {
    %c0_i32 = arith.constant 0 : i32
    %c0_i32_0 = arith.constant 0 : i32
    %c0_i32_1 = arith.constant 0 : i32
    return %c0_i32, %c0_i32_0 : i32, i32
  }
  func.func @transform_9(%arg0: i32) -> (i32, i32) {
    %c0_i32 = arith.constant 0 : i32
    %c0_i32_0 = arith.constant 0 : i32
    return %arg0, %c0_i32 : i32, i32
  }
}

module attributes {stable_mosaic.version = 11 : i64} {
  func.func @_transition_kernel(%arg0: i32, %arg1: memref<16x128xbf16, #tpu.memory_space<vmem>>, %arg2: memref<2x128x128xbf16, #tpu.memory_space<vmem>>, %arg3: memref<2x1x128xf32, #tpu.memory_space<vmem>>, %arg4: memref<2x128x128xbf16, #tpu.memory_space<vmem>>, %arg5: memref<2x1x128xf32, #tpu.memory_space<vmem>>, %arg6: memref<2x128x128xbf16, #tpu.memory_space<vmem>>, %arg7: memref<2x1x128xf32, #tpu.memory_space<vmem>>, %arg8: memref<1x128xf32, #tpu.memory_space<vmem>>, %arg9: memref<1x128xf32, #tpu.memory_space<vmem>>, %arg10: memref<16x128xf32, #tpu.memory_space<vmem>>) attributes {dimension_semantics = [#tpu.dimension_semantics<parallel>], iteration_bounds = array<i64: 2>, scalar_prefetch = 0 : i64, scratch_operands = 0 : i64, tpu.core_type = #tpu.core_type<tc>, window_params = [{transform_indices = @transform_0, window_bounds = array<i64: 16, 128>}, {pipeline_mode = #tpu.pipeline_mode<synchronous>, transform_indices = @transform_1, window_bounds = array<i64: 2, 128, 128>}, {pipeline_mode = #tpu.pipeline_mode<synchronous>, transform_indices = @transform_2, window_bounds = array<i64: 2, 1, 128>}, {pipeline_mode = #tpu.pipeline_mode<synchronous>, transform_indices = @transform_3, window_bounds = array<i64: 2, 128, 128>}, {pipeline_mode = #tpu.pipeline_mode<synchronous>, transform_indices = @transform_4, window_bounds = array<i64: 2, 1, 128>}, {pipeline_mode = #tpu.pipeline_mode<synchronous>, transform_indices = @transform_5, window_bounds = array<i64: 2, 128, 128>}, {pipeline_mode = #tpu.pipeline_mode<synchronous>, transform_indices = @transform_6, window_bounds = array<i64: 2, 1, 128>}, {pipeline_mode = #tpu.pipeline_mode<synchronous>, transform_indices = @transform_7, window_bounds = array<i64: 1, 128>}, {pipeline_mode = #tpu.pipeline_mode<synchronous>, transform_indices = @transform_8, window_bounds = array<i64: 1, 128>}, {transform_indices = @transform_9, window_bounds = array<i64: 16, 128>}]} {
    %c0 = arith.constant 0 : index
    %c0_0 = arith.constant 0 : index
    %0 = vector.load %arg1[%c0, %c0_0] : memref<16x128xbf16, #tpu.memory_space<vmem>>, vector<16x128xbf16>
    %1 = arith.extf %0 : vector<16x128xbf16> to vector<16x128xf32>
    %2 = arith.truncf %1 : vector<16x128xf32> to vector<16x128xbf16>
    %c0_1 = arith.constant 0 : index
    %c0_2 = arith.constant 0 : index
    %c0_3 = arith.constant 0 : index
    %3 = vector.load %arg2[%c0_1, %c0_2, %c0_3] : memref<2x128x128xbf16, #tpu.memory_space<vmem>>, vector<1x128x128xbf16>
    %4 = vector.shape_cast %3 : vector<1x128x128xbf16> to vector<128x128xbf16>
    %cst = arith.constant dense<0.000000e+00> : vector<16x128xf32>
    %5 = tpu.matmul %2, %4, %cst {dimension_numbers = #tpu.dot_dimension_numbers<[1], [0], [0], [1], [0, 0, 1, 1], [], []>} : vector<16x128xbf16>, vector<128x128xbf16>, vector<16x128xf32> -> vector<16x128xf32>
    %c0_4 = arith.constant 0 : index
    %c0_5 = arith.constant 0 : index
    %c0_6 = arith.constant 0 : index
    %6 = vector.load %arg3[%c0_4, %c0_5, %c0_6] : memref<2x1x128xf32, #tpu.memory_space<vmem>>, vector<1x1x128xf32>
    %7 = vector.shape_cast %6 : vector<1x1x128xf32> to vector<1x128xf32>
    %8 = vector.broadcast %7 : vector<1x128xf32> to vector<16x128xf32>
    %9 = arith.addf %5, %8 : vector<16x128xf32>
    %cst_7 = arith.constant 0.000000e+00 : f32
    %10 = vector.broadcast %cst_7 : f32 to vector<16x128xf32>
    %11 = arith.maximumf %9, %10 : vector<16x128xf32>
    %12 = arith.truncf %11 : vector<16x128xf32> to vector<16x128xbf16>
    %c0_8 = arith.constant 0 : index
    %c0_9 = arith.constant 0 : index
    %c0_10 = arith.constant 0 : index
    %13 = vector.load %arg4[%c0_8, %c0_9, %c0_10] : memref<2x128x128xbf16, #tpu.memory_space<vmem>>, vector<1x128x128xbf16>
    %14 = vector.shape_cast %13 : vector<1x128x128xbf16> to vector<128x128xbf16>
    %cst_11 = arith.constant dense<0.000000e+00> : vector<16x128xf32>
    %15 = tpu.matmul %12, %14, %cst_11 {dimension_numbers = #tpu.dot_dimension_numbers<[1], [0], [0], [1], [0, 0, 1, 1], [], []>} : vector<16x128xbf16>, vector<128x128xbf16>, vector<16x128xf32> -> vector<16x128xf32>
    %c0_12 = arith.constant 0 : index
    %c0_13 = arith.constant 0 : index
    %c0_14 = arith.constant 0 : index
    %16 = vector.load %arg5[%c0_12, %c0_13, %c0_14] : memref<2x1x128xf32, #tpu.memory_space<vmem>>, vector<1x1x128xf32>
    %17 = vector.shape_cast %16 : vector<1x1x128xf32> to vector<1x128xf32>
    %18 = vector.broadcast %17 : vector<1x128xf32> to vector<16x128xf32>
    %19 = arith.addf %15, %18 : vector<16x128xf32>
    %cst_15 = arith.constant 0.000000e+00 : f32
    %20 = vector.broadcast %cst_15 : f32 to vector<16x128xf32>
    %21 = arith.maximumf %19, %20 : vector<16x128xf32>
    %22 = arith.truncf %21 : vector<16x128xf32> to vector<16x128xbf16>
    %c0_16 = arith.constant 0 : index
    %c0_17 = arith.constant 0 : index
    %c0_18 = arith.constant 0 : index
    %23 = vector.load %arg6[%c0_16, %c0_17, %c0_18] : memref<2x128x128xbf16, #tpu.memory_space<vmem>>, vector<1x128x128xbf16>
    %24 = vector.shape_cast %23 : vector<1x128x128xbf16> to vector<128x128xbf16>
    %cst_19 = arith.constant dense<0.000000e+00> : vector<16x128xf32>
    %25 = tpu.matmul %22, %24, %cst_19 {dimension_numbers = #tpu.dot_dimension_numbers<[1], [0], [0], [1], [0, 0, 1, 1], [], []>} : vector<16x128xbf16>, vector<128x128xbf16>, vector<16x128xf32> -> vector<16x128xf32>
    %c0_20 = arith.constant 0 : index
    %c0_21 = arith.constant 0 : index
    %c0_22 = arith.constant 0 : index
    %26 = vector.load %arg7[%c0_20, %c0_21, %c0_22] : memref<2x1x128xf32, #tpu.memory_space<vmem>>, vector<1x1x128xf32>
    %27 = vector.shape_cast %26 : vector<1x1x128xf32> to vector<1x128xf32>
    %28 = vector.broadcast %27 : vector<1x128xf32> to vector<16x128xf32>
    %29 = arith.addf %25, %28 : vector<16x128xf32>
    %30 = arith.addf %1, %29 : vector<16x128xf32>
    %31 = arith.truncf %30 : vector<16x128xf32> to vector<16x128xbf16>
    %c1 = arith.constant 1 : index
    %c0_23 = arith.constant 0 : index
    %c0_24 = arith.constant 0 : index
    %32 = vector.load %arg2[%c1, %c0_23, %c0_24] : memref<2x128x128xbf16, #tpu.memory_space<vmem>>, vector<1x128x128xbf16>
    %33 = vector.shape_cast %32 : vector<1x128x128xbf16> to vector<128x128xbf16>
    %cst_25 = arith.constant dense<0.000000e+00> : vector<16x128xf32>
    %34 = tpu.matmul %31, %33, %cst_25 {dimension_numbers = #tpu.dot_dimension_numbers<[1], [0], [0], [1], [0, 0, 1, 1], [], []>} : vector<16x128xbf16>, vector<128x128xbf16>, vector<16x128xf32> -> vector<16x128xf32>
    %c1_26 = arith.constant 1 : index
    %c0_27 = arith.constant 0 : index
    %c0_28 = arith.constant 0 : index
    %35 = vector.load %arg3[%c1_26, %c0_27, %c0_28] : memref<2x1x128xf32, #tpu.memory_space<vmem>>, vector<1x1x128xf32>
    %36 = vector.shape_cast %35 : vector<1x1x128xf32> to vector<1x128xf32>
    %37 = vector.broadcast %36 : vector<1x128xf32> to vector<16x128xf32>
    %38 = arith.addf %34, %37 : vector<16x128xf32>
    %cst_29 = arith.constant 0.000000e+00 : f32
    %39 = vector.broadcast %cst_29 : f32 to vector<16x128xf32>
    %40 = arith.maximumf %38, %39 : vector<16x128xf32>
    %41 = arith.truncf %40 : vector<16x128xf32> to vector<16x128xbf16>
    %c1_30 = arith.constant 1 : index
    %c0_31 = arith.constant 0 : index
    %c0_32 = arith.constant 0 : index
    %42 = vector.load %arg4[%c1_30, %c0_31, %c0_32] : memref<2x128x128xbf16, #tpu.memory_space<vmem>>, vector<1x128x128xbf16>
    %43 = vector.shape_cast %42 : vector<1x128x128xbf16> to vector<128x128xbf16>
    %cst_33 = arith.constant dense<0.000000e+00> : vector<16x128xf32>
    %44 = tpu.matmul %41, %43, %cst_33 {dimension_numbers = #tpu.dot_dimension_numbers<[1], [0], [0], [1], [0, 0, 1, 1], [], []>} : vector<16x128xbf16>, vector<128x128xbf16>, vector<16x128xf32> -> vector<16x128xf32>
    %c1_34 = arith.constant 1 : index
    %c0_35 = arith.constant 0 : index
    %c0_36 = arith.constant 0 : index
    %45 = vector.load %arg5[%c1_34, %c0_35, %c0_36] : memref<2x1x128xf32, #tpu.memory_space<vmem>>, vector<1x1x128xf32>
    %46 = vector.shape_cast %45 : vector<1x1x128xf32> to vector<1x128xf32>
    %47 = vector.broadcast %46 : vector<1x128xf32> to vector<16x128xf32>
    %48 = arith.addf %44, %47 : vector<16x128xf32>
    %cst_37 = arith.constant 0.000000e+00 : f32
    %49 = vector.broadcast %cst_37 : f32 to vector<16x128xf32>
    %50 = arith.maximumf %48, %49 : vector<16x128xf32>
    %51 = arith.truncf %50 : vector<16x128xf32> to vector<16x128xbf16>
    %c1_38 = arith.constant 1 : index
    %c0_39 = arith.constant 0 : index
    %c0_40 = arith.constant 0 : index
    %52 = vector.load %arg6[%c1_38, %c0_39, %c0_40] : memref<2x128x128xbf16, #tpu.memory_space<vmem>>, vector<1x128x128xbf16>
    %53 = vector.shape_cast %52 : vector<1x128x128xbf16> to vector<128x128xbf16>
    %cst_41 = arith.constant dense<0.000000e+00> : vector<16x128xf32>
    %54 = tpu.matmul %51, %53, %cst_41 {dimension_numbers = #tpu.dot_dimension_numbers<[1], [0], [0], [1], [0, 0, 1, 1], [], []>} : vector<16x128xbf16>, vector<128x128xbf16>, vector<16x128xf32> -> vector<16x128xf32>
    %c1_42 = arith.constant 1 : index
    %c0_43 = arith.constant 0 : index
    %c0_44 = arith.constant 0 : index
    %55 = vector.load %arg7[%c1_42, %c0_43, %c0_44] : memref<2x1x128xf32, #tpu.memory_space<vmem>>, vector<1x1x128xf32>
    %56 = vector.shape_cast %55 : vector<1x1x128xf32> to vector<1x128xf32>
    %57 = vector.broadcast %56 : vector<1x128xf32> to vector<16x128xf32>
    %58 = arith.addf %54, %57 : vector<16x128xf32>
    %59 = arith.addf %30, %58 : vector<16x128xf32>
    %cst_45 = arith.constant dense<0.000000e+00> : vector<16xf32>
    %60 = vector.multi_reduction <add>, %59, %cst_45 [1] : vector<16x128xf32> to vector<16xf32>
    %61 = vector.shape_cast %60 : vector<16xf32> to vector<16x1xf32>
    %cst_46 = arith.constant 7.812500e-03 : f32
    %62 = vector.broadcast %cst_46 : f32 to vector<16x1xf32>
    %63 = arith.mulf %61, %62 : vector<16x1xf32>
    %64 = arith.mulf %59, %59 : vector<16x128xf32>
    %cst_47 = arith.constant dense<0.000000e+00> : vector<16xf32>
    %65 = vector.multi_reduction <add>, %64, %cst_47 [1] : vector<16x128xf32> to vector<16xf32>
    %66 = vector.shape_cast %65 : vector<16xf32> to vector<16x1xf32>
    %cst_48 = arith.constant 7.812500e-03 : f32
    %67 = vector.broadcast %cst_48 : f32 to vector<16x1xf32>
    %68 = arith.mulf %66, %67 : vector<16x1xf32>
    %69 = arith.mulf %63, %63 : vector<16x1xf32>
    %70 = arith.subf %68, %69 : vector<16x1xf32>
    %cst_49 = arith.constant 0.000000e+00 : f32
    %71 = vector.broadcast %cst_49 : f32 to vector<16x1xf32>
    %72 = arith.maximumf %70, %71 : vector<16x1xf32>
    %cst_50 = arith.constant 9.99999974E-6 : f32
    %73 = vector.broadcast %cst_50 : f32 to vector<16x1xf32>
    %74 = arith.addf %72, %73 : vector<16x1xf32>
    %75 = math.rsqrt %74 : vector<16x1xf32>
    %76 = vector.broadcast %63 : vector<16x1xf32> to vector<16x128xf32>
    %77 = arith.subf %59, %76 : vector<16x128xf32>
    %78 = vector.broadcast %75 : vector<16x1xf32> to vector<16x128xf32>
    %79 = arith.mulf %77, %78 : vector<16x128xf32>
    %c0_51 = arith.constant 0 : index
    %c0_52 = arith.constant 0 : index
    %80 = vector.load %arg8[%c0_51, %c0_52] : memref<1x128xf32, #tpu.memory_space<vmem>>, vector<1x128xf32>
    %81 = vector.broadcast %80 : vector<1x128xf32> to vector<16x128xf32>
    %82 = arith.mulf %79, %81 : vector<16x128xf32>
    %c0_53 = arith.constant 0 : index
    %c0_54 = arith.constant 0 : index
    %83 = vector.load %arg9[%c0_53, %c0_54] : memref<1x128xf32, #tpu.memory_space<vmem>>, vector<1x128xf32>
    %84 = vector.broadcast %83 : vector<1x128xf32> to vector<16x128xf32>
    %85 = arith.addf %82, %84 : vector<16x128xf32>
    %c0_55 = arith.constant 0 : index
    %c0_56 = arith.constant 0 : index
    %86 = vector.load %arg10[%c0_55, %c0_56] : memref<16x128xf32, #tpu.memory_space<vmem>>, vector<16x128xf32>
    tpu.vector_store %arg10[%c0_55, %c0_56], %85 {strides = array<i32>} : memref<16x128xf32, #tpu.memory_space<vmem>>, vector<16x128xf32>,
    return
  }
  func.func @transform_0(%arg0: i32) -> (i32, i32) {
    %c0_i32 = arith.constant 0 : i32
    %c0_i32_0 = arith.constant 0 : i32
    return %arg0, %c0_i32 : i32, i32
  }
  func.func @transform_1(%arg0: i32) -> (i32, i32, i32) {
    %c0_i32 = arith.constant 0 : i32
    %c0_i32_0 = arith.constant 0 : i32
    %c0_i32_1 = arith.constant 0 : i32
    %c0_i32_2 = arith.constant 0 : i32
    return %c0_i32, %c0_i32_0, %c0_i32_1 : i32, i32, i32
  }
  func.func @transform_2(%arg0: i32) -> (i32, i32, i32) {
    %c0_i32 = arith.constant 0 : i32
    %c0_i32_0 = arith.constant 0 : i32
    %c0_i32_1 = arith.constant 0 : i32
    %c0_i32_2 = arith.constant 0 : i32
    return %c0_i32, %c0_i32_0, %c0_i32_1 : i32, i32, i32
  }
  func.func @transform_3(%arg0: i32) -> (i32, i32, i32) {
    %c0_i32 = arith.constant 0 : i32
    %c0_i32_0 = arith.constant 0 : i32
    %c0_i32_1 = arith.constant 0 : i32
    %c0_i32_2 = arith.constant 0 : i32
    return %c0_i32, %c0_i32_0, %c0_i32_1 : i32, i32, i32
  }
  func.func @transform_4(%arg0: i32) -> (i32, i32, i32) {
    %c0_i32 = arith.constant 0 : i32
    %c0_i32_0 = arith.constant 0 : i32
    %c0_i32_1 = arith.constant 0 : i32
    %c0_i32_2 = arith.constant 0 : i32
    return %c0_i32, %c0_i32_0, %c0_i32_1 : i32, i32, i32
  }
  func.func @transform_5(%arg0: i32) -> (i32, i32, i32) {
    %c0_i32 = arith.constant 0 : i32
    %c0_i32_0 = arith.constant 0 : i32
    %c0_i32_1 = arith.constant 0 : i32
    %c0_i32_2 = arith.constant 0 : i32
    return %c0_i32, %c0_i32_0, %c0_i32_1 : i32, i32, i32
  }
  func.func @transform_6(%arg0: i32) -> (i32, i32, i32) {
    %c0_i32 = arith.constant 0 : i32
    %c0_i32_0 = arith.constant 0 : i32
    %c0_i32_1 = arith.constant 0 : i32
    %c0_i32_2 = arith.constant 0 : i32
    return %c0_i32, %c0_i32_0, %c0_i32_1 : i32, i32, i32
  }
  func.func @transform_7(%arg0: i32) -> (i32, i32) {
    %c0_i32 = arith.constant 0 : i32
    %c0_i32_0 = arith.constant 0 : i32
    %c0_i32_1 = arith.constant 0 : i32
    return %c0_i32, %c0_i32_0 : i32, i32
  }
  func.func @transform_8(%arg0: i32) -> (i32, i32) {
    %c0_i32 = arith.constant 0 : i32
    %c0_i32_0 = arith.constant 0 : i32
    %c0_i32_1 = arith.constant 0 : i32
    return %c0_i32, %c0_i32_0 : i32, i32
  }
  func.func @transform_9(%arg0: i32) -> (i32, i32) {
    %c0_i32 = arith.constant 0 : i32
    %c0_i32_0 = arith.constant 0 : i32
    return %arg0, %c0_i32 : i32, i32
  }
}

</mosaic_0001>

<bundles_post_ra>
// kernel: tpu_custom_call.1
= control target key start
LH: loop header
LB: loop body
LE: loop exit
PB: predicated region body
PF: predicated region fallthrough
CT: control target
= control target key end

     0   :  { %s1993_s0 = inlined_call_operand.hbm [shape: bf16[32,128], index: 0, kind: input, shape index: {}]   ;;  %s1994_s1 = inlined_call_operand.hbm [shape: bf16[2,128,128], index: 1, kind: input, shape index: {}]   ;;  %s1995_s2 = inlined_call_operand.hbm [shape: f32[2,1,128], index: 2, kind: input, shape index: {}]   ;;  %s1996_s3 = inlined_call_operand.hbm [shape: bf16[2,128,128], index: 3, kind: input, shape index: {}]   ;;  %s1997_s4 = inlined_call_operand.vmem [shape: f32[2,1,128], index: 4, kind: input, shape index: {}]   ;;  %s1998_s5 = inlined_call_operand.hbm [shape: bf16[2,128,128], index: 5, kind: input, shape index: {}]   ;;  %s1999_s6 = inlined_call_operand.vmem [shape: f32[2,1,128], index: 6, kind: input, shape index: {}]   ;;  %s2000_s7 = inlined_call_operand.vmem [shape: f32[1,128], index: 7, kind: input, shape index: {}]   ;;  %s2001_s8 = inlined_call_operand.vmem [shape: f32[1,128], index: 8, kind: input, shape index: {}]   ;;  %s2002_s9 = inlined_call_operand.hbm [shape: f32[32,128], index: 9, kind: output, shape index: {}]  }
   0x1   :  { %2005 = sst [smem:[#allocation16_spill]] %s1994_s1 }
   0x2   :  { %2006 = sst [smem:[#allocation17_spill]] %s1995_s2 }
   0x3   :  { %2007 = sst [smem:[#allocation18_spill]] %s1996_s3 }
   0x4   :  { %14 = vsyncpa [#allocation3], 0 }
   0x5   :  { %16 = vsyncpa [#allocation3 + $0x1], 0 }
   0x6   :  { %17 = vsyncpa [#allocation6], 0 }
   0x7   :  { %18 = vsyncpa [#allocation9], 0 }
   0x8   :  { %19 = vsyncpa [#allocation4], 0 }
   0x9   :  { %21 = vsyncpa [#allocation4 + $0x1], 0  ;;  %s1795_s30 = smov 0   ;;  %s1797_s10 = smov 0  }
   0xa   :  { %s1799_s11 = smov 0   ;;  %s1801_s12 = smov 0  }
   0xb LB: > { %s1816_s13 = sadd.s32 4294967295, %s1733_s12   ;;  %s1133_s14 = sadd.s32 4294967294, %s1733_s12   ;;  %s1733_s12 = sphi %s1801_s12, %s2023_s12   ;;  %s1729_s11 = sphi %s1799_s11, %s2022_s11   ;;  %s1725_s10 = sphi %s1797_s10, %s2021_s10   ;;  %s1721_s30 = sphi %s1795_s30, %s2020_s30  }
   0xc   : > { %p47_p0 = scmp.ne.s32.totalorder %s1725_s10, %s1721_s30  ;;  %p48_p1 = scmp.eq.s32.totalorder %s1816_s13, 0 }
   0xd   : > { %p239_p2 = scmp.eq.s32.totalorder %s1816_s13, 1  ;;  %p245_p3 = scmp.eq.s32.totalorder %s1133_s14, 1 }
   0xe   : > { %p1825_p4 = por %p48_p1, %p47_p0  ;;  %p1134_p5 = scmp.ge.s32.totalorder %s1733_s12, 1 }
   0xf   : > { %p1830_p6 = por %p245_p3, %p47_p0  ;;  %p252_p7 = scmp.lt.s32.totalorder %s1733_s12, 3 }
  0x10   : > { %s2010_s1 = sld [smem:[#allocation16_spill]]  ;;  %s1735_s21 = smov [#allocation5]  }
  0x11   : > { %p1838_p8 = pnand %p1134_p5, %p252_p7  ;;  %s265_s22 = sshll.u32 %s1735_s21, 4  ;;  %s266_s22 = int_to_ptr.vmem [resolvable:$true] %s265_s22 }
  0x12   : > { %s2013_s3 = sld [smem:[#allocation18_spill]]  ;;  %s2003_s27 = smov 64  }
  0x13   : > { %p1424_p9 = pneg %p1838_p8  ;;  %s2004_s28 = smov 4  }
  0x14   : > { %s1738_s29 = smov [#allocation8]   ;;  %s2014_s2 = sld [smem:[#allocation17_spill]] }
  0x15   : > { %p1846_p10 = pnand %p1424_p9, %p48_p1  ;;  %s293_s14 = sshll.u32 %s1738_s29, 4  ;;  %s294_s14 = int_to_ptr.vmem [resolvable:$true] %s293_s14 }
  0x16   : > { %s263_s19 = sshll.u32 %s2010_s1, 4  ;;  %s308_s29 = sshll.u32 %s1998_s5, 4  ;;  %s264_s19 = int_to_ptr.hbm [resolvable:$true] %s263_s19  ;;  %s309_s29 = int_to_ptr.hbm [resolvable:$true] %s308_s29 }
  0x17   : > { %1427 = dma.hbm_to_vmem [thread:$0]  (!%p1846_p10), %s264_s19, 2048, %s266_s22, [#allocation6], %s2003_s27, %s2003_s27, %s2004_s28  }
  0x18   : > { %s291_s26 = sshll.u32 %s2013_s3, 4  ;;  %s1739_s19 = smov [#allocation7]   ;;  %s292_s26 = int_to_ptr.hbm [resolvable:$true] %s291_s26 }
  0x19   : > { %1433 = dma.hbm_to_vmem [thread:$0]  (!%p1846_p10), %s292_s26, 2048, %s294_s14, [#allocation9], %s2003_s27, %s2003_s27, %s2004_s28  }
  0x1a   : > { %s277_s21 = sshll.u32 %s2014_s2, 4  ;;  %s279_s22 = sshll.u32 %s1739_s19, 4  ;;  %s278_s21 = int_to_ptr.hbm [resolvable:$true] %s277_s21  ;;  %s280_s22 = int_to_ptr.vmem [resolvable:$true] %s279_s22 }
  0x1b   : > { %s1740_s17 = smov 16   ;;  %s1741_s18 = smov 1  }
  0x1c   : > { %1430 = dma.hbm_to_vmem [thread:$0]  (!%p1846_p10), %s278_s21, 32, %s280_s22, [#allocation6], %s1740_s17, %s1740_s17, %s1741_s18  }
  0x1d   : > { %s1742_s26 = smov [#allocation10]   ;;  %s1878_s19 = sadd.s32 1, %s1733_s12  }
  0x1e   : > { %s310_s14 = sshll.u32 %s1742_s26, 4  ;;  %s34_s24 = sadd.s32 1, %s1729_s11  ;;  %s311_s14 = int_to_ptr.vmem [resolvable:$true] %s310_s14 }
  0x1f   : > { %1436 = dma.hbm_to_vmem [thread:$0]  (!%p1846_p10), %s309_s29, 2048, %s311_s14, [#allocation9], %s2003_s27, %s2003_s27, %s2004_s28  }
  0x20   : > { %s31_s25 = ssub.s32 %s1733_s12, %s1878_s19  ;;  %p41_p12 = scmp.ne.s32.totalorder %s1729_s11, %s1725_s10 }
  0x21   : > { %p32_p13 = scmp.eq.s32.totalorder %s31_s25, 0  ;;  %p42_p0 = scmp.eq.s32.totalorder %s1733_s12, 0 }
  0x22   : > { %p1888_p3 = por %p239_p2, %p41_p12  ;;  %p1449_p5 = scmp.lt.s32.totalorder %s1733_s12, 2 }
  0x23   : > { %s1894_s22 = scalar_select %p32_p13, %s1729_s11, %s34_s24  }
  0x24   : > { %p43_p7 = por %p42_p0, %p41_p12  ;;  %s333_s23 = sand.u32 1, %s1729_s11  }
  0x25   : > { %s1140_s17 = sshll.u32 %s333_s23, 3  ;;  %s1353_s29 = sshll.u32 %s1733_s12, 3 }
  0x26   : > { %s342_s14 = scalar_lea.hbm %s1993_s0, %s1353_s29  ;;  %s337_s27 = scalar_lea.vmem [#allocation2], %s1140_s17 }
  0x27   : > { %s345_s28 = sshll.u32 %s337_s27, 4  ;;  %s343_s25 = sshll.u32 %s342_s14, 4  ;;  %s346_s28 = int_to_ptr.vmem [resolvable:$true] %s345_s28  ;;  %s344_s25 = int_to_ptr.hbm [resolvable:$true] %s343_s25 }
  0x28   : > { %p1901_p2 = pnand %p1449_p5, %p43_p7  ;;  %s334_s24 = scalar_lea.sflag [#allocation3], %s333_s23 }
  0x29   : > { %s1629_s2 = sshra.s32 %s344_s25, 4  ;;  %s1636_s27 = scalar_lea.hbm %s1993_s0, 16  ;;  %s1630_s2 = int_to_ptr.hbm [resolvable:$true] %s1629_s2 }
  0x2a   : > { %s1631_s3 = scalar_lea.hbm %s1630_s2, 8  ;;  %p1633_p10 = pneg %p1901_p2 }
  0x2b   : > { %p1632_p9 = scmp.ne.s32.totalorder %s1630_s2, %s1631_s3  ;;  %p1637_p0 = scmp.lt.s32.totalorder %s1630_s2, %s1993_s0 }
  0x2c   : > { %p1638_p5 = scmp.lt.s32.totalorder %s1636_s27, %s1631_s3 }
  0x2d   : > { %p1634_p12 = pnand %p1633_p10, %p1632_p9 }
  0x2e   : > { %p1639_p7 = por %p1638_p5, %p1637_p0 }
  0x2f   : > { %p1635_p13 = pneg %p1634_p12 }
  0x31   : > { %p1640_p11 = pnand %p1639_p7, %p1635_p13 }
  0x33   : > { %1643 = shalt.err (!%p1640_p11)
}
  0x34   : > { %s2017_s23 = smov 4   ;;  %s2018_s14 = smov 64  }
  0x35   : > { %1440 = dma.hbm_to_vmem [thread:$0]  (!%p1901_p2), %s344_s25, 128, %s346_s28, %s334_s24, %s2018_s14, %s2018_s14, %s2017_s23  }
  0x36   : > { %357 = sbr.rel (%p1838_p8) target bundleno = 1100 (0x44c), region = 56  ;;  %s1921_s29 = sand.u32 (!%p1838_p8), 1, %s1725_s10  }
  0x37   : > { %s1144_s2 = sshll.u32 (!%p1838_p8), %s1921_s29, 3  ;;  %s360_s3 = scalar_lea.sflag (!%p1838_p8), [#allocation3], %s1921_s29 }
  0x38   : > { %s1925_s17 = scalar_lea.vmem (!%p1838_p8), [#allocation2], %s1144_s2 }
  0x3b   : > { %1704 = dma.done.wait (%p1825_p4), %s360_s3, 128  }
  0x3c   : > { %1706 = vsyncadd (%p1825_p4), %s360_s3, 4294967168 }
  0x3d   : > { %1708 = dma.done.wait (%p48_p1), [#allocation6], 2080  }
  0x3e   : > { %1710 = vsyncadd (%p48_p1), [#allocation6], 4294965216 }
  0x3f   : > { %1712 = dma.done.wait (%p48_p1), [#allocation9], 4096  }
  0x40   : > { %1714 = vsyncadd (%p48_p1), [#allocation9], 4294963200  ;;  %v1362_v0 = vld [vmem:[#allocation5 + $0x38] sm:$0xff]  ;;  %v1361_v1 = vld [vmem:[#allocation5 + $0x30] sm:$0xff]  ;;  %s1149_s3 = sshll.u32 %s1921_s29, 4  ;;  %s1679_s14 = scalar_lea.hbm %s2002_s9, 32 }
  0x41   : > { %499 = vmatpush.bf16.msra.mxu0 %v1362_v0  ;;  %v1370_v2 = vld [vmem:[#allocation8 + $0x38] sm:$0xff]  ;;  %v1360_v3 = vld [vmem:[#allocation5 + $0x28] sm:$0xff]  ;;  %v1369_v4 = vld [vmem:[#allocation8 + $0x30] sm:$0xff]  ;;  %s418_s1 = scalar_lea.vmem [#allocation11], %s1149_s3 }
  0x42   : > { %584 = vmatpush.bf16.msra.mxu1 %v1370_v2  ;;  %v1368_v5 = vld [vmem:[#allocation8 + $0x28] sm:$0xff]  ;;  %v1359_v6 = vld [vmem:[#allocation5 + $0x20] sm:$0xff]  ;;  %v1358_v8 = vld [vmem:[#allocation5 + $0x18] sm:$0xff]  ;;  %s1019_s25 = sshll.u32 %s418_s1, 4  ;;  %s1020_s25 = int_to_ptr.vmem [resolvable:$true] %s1019_s25 }
  0x43   : > { %v1367_v7 = vld [vmem:[#allocation8 + $0x20] sm:$0xff]  ;;  %v1357_v9 = vld [vmem:[#allocation5 + $0x10] sm:$0xff]  ;;  %v1366_v13 = vld [vmem:[#allocation8 + $0x18] sm:$0xff] }
  0x44   : > { %v1356_v10 = vld [vmem:[#allocation5 + $0x8] sm:$0xff]  ;;  %v1355_v11 = vld [vmem:[#allocation5] sm:$0xff]  ;;  %v1354_v12 = vld [vmem:[%s1925_s17] sm:$0xff] }
  0x45   : > { %500 = vmatpush.bf16.msra.mxu0 %v1361_v1  ;;  %v1365_v14 = vld [vmem:[#allocation8 + $0x10] sm:$0xff]  ;;  %v1364_v15 = vld [vmem:[#allocation8 + $0x8] sm:$0xff]  ;;  %v1363_v16 = vld [vmem:[#allocation8] sm:$0xff] }
  0x46   : > { %585 = vmatpush.bf16.msra.mxu1 %v1369_v4  ;;  %v1378_v17 = vld [vmem:[#allocation10 + $0x38] sm:$0xff]  ;;  %v1377_v18 = vld [vmem:[#allocation10 + $0x30] sm:$0xff]  ;;  %v1376_v19 = vld [vmem:[#allocation10 + $0x28] sm:$0xff] }
  0x47   : > { %669 = vmatpush.bf16.msra.mxu2 %v1378_v17  ;;  %v1375_v20 = vld [vmem:[#allocation10 + $0x20] sm:$0xff]  ;;  %v1497_v22 = vld [vmem:[#allocation7] ss:$0 sm:$0xff]  ;;  %v1373_v30 = vld [vmem:[#allocation10 + $0x10] sm:$0xff] }
  0x48   : > { %v1374_v29 = vld [vmem:[#allocation10 + $0x18] sm:$0xff]  ;;  %v1372_v31 = vld [vmem:[#allocation10 + $0x8] sm:$0xff]  ;;  %v1371_v32 = vld [vmem:[#allocation10] sm:$0xff] }
  0x49   : > { %501 = vmatpush.bf16.msra.mxu0 %v1360_v3  ;;  %v1386_v33 = vld [vmem:[#allocation5 + $0x78] sm:$0xff]  ;;  %v1385_v34 = vld [vmem:[#allocation5 + $0x70] sm:$0xff]  ;;  %v1384_v35 = vld [vmem:[#allocation5 + $0x68] sm:$0xff] }
  0x4a   : > { %586 = vmatpush.bf16.msra.mxu1 %v1368_v5  ;;  %756 = vmatpush.bf16.msra.mxu3 %v1386_v33  ;;  %v1383_v36 = vld [vmem:[#allocation5 + $0x60] sm:$0xff]  ;;  %v1498_v38 = vld [vmem:[%s1997_s4] ss:$0 sm:$0xff]  ;;  %v1382_v45 = vld [vmem:[#allocation5 + $0x58] sm:$0xff] }
  0x4b   : > { %670 = vmatpush.bf16.msra.mxu2 %v1377_v18  ;;  %v1381_v46 = vld [vmem:[#allocation5 + $0x50] sm:$0xff]  ;;  %v1380_v47 = vld [vmem:[#allocation5 + $0x48] sm:$0xff]  ;;  %v1379_v48 = vld [vmem:[#allocation5 + $0x40] sm:$0xff] }
  0x4c   : > { %v1394_v49 = vld [vmem:[#allocation8 + $0x78] sm:$0xff]  ;;  %v1393_v50 = vld [vmem:[#allocation8 + $0x70] sm:$0xff]  ;;  %v1392_v51 = vld [vmem:[#allocation8 + $0x68] sm:$0xff] }
  0x4d   : > { %502 = vmatpush.bf16.msra.mxu0 %v1359_v6  ;;  %v1391_v52 = vld [vmem:[#allocation8 + $0x60] sm:$0xff]  ;;  %v1499_v54 = vld [vmem:[%s1999_s6] ss:$0 sm:$0xff]  ;;  %v1390_v0 = vld [vmem:[#allocation8 + $0x58] sm:$0xff] }
  0x4e   : > { %587 = vmatpush.bf16.msra.mxu1 %v1367_v7  ;;  %757 = vmatpush.bf16.msra.mxu3 %v1385_v34  ;;  %v421_v55 = vld [vmem:[%s1925_s17] sm:$0xff]   ;;  %v1387_v3 = vld [vmem:[#allocation8 + $0x40] sm:$0xff]  ;;  %s1403_s17 = sshll.u32 %s1816_s13, 4  ;;  %s1007_s13 = scalar_lea.sflag [#allocation4], %s1921_s29 }
  0x4f   : > { %671 = vmatpush.bf16.msra.mxu2 %v1376_v19  ;;  %v423_v56 = vunpack.c.l.bf16 %v421_v55  ;;  %v424_v58 = vunpack.c.h.bf16 %v421_v55  ;;  %v1389_v1 = vld [vmem:[#allocation8 + $0x50] sm:$0xff]  ;;  %v1388_v2 = vld [vmem:[#allocation8 + $0x48] sm:$0xff]  ;;  %v1402_v4 = vld [vmem:[#allocation10 + $0x78] sm:$0xff]  ;;  %s1018_s28 = scalar_lea.hbm %s2002_s9, %s1403_s17 }
  0x50   : > { %v1401_v5 = vld [vmem:[#allocation10 + $0x70] sm:$0xff]  ;;  %v1400_v6 = vld [vmem:[#allocation10 + $0x68] sm:$0xff]  ;;  %v1399_v7 = vld [vmem:[#allocation10 + $0x60] sm:$0xff]  ;;  %s1021_s24 = sshll.u32 %s1018_s28, 4  ;;  %s1022_s24 = int_to_ptr.hbm [resolvable:$true] %s1021_s24 }
  0x51   : > { %503 = vmatpush.bf16.msra.mxu0 %v1358_v8  ;;  %v1397_v17 = vld [vmem:[#allocation10 + $0x50] sm:$0xff]  ;;  %v1396_v18 = vld [vmem:[#allocation10 + $0x48] sm:$0xff]  ;;  %v1395_v19 = vld [vmem:[#allocation10 + $0x40] sm:$0xff]  ;;  %s1673_s27 = sshra.s32 %s1022_s24, 4  ;;  %s1674_s27 = int_to_ptr.hbm [resolvable:$true] %s1673_s27 }
  0x52   : > { %588 = vmatpush.bf16.msra.mxu1 %v1366_v13  ;;  %758 = vmatpush.bf16.msra.mxu3 %v1384_v35  ;;  %s1675_s18 = scalar_lea.hbm %s1674_s27, 16  ;;  %p1680_p11 = scmp.lt.s32.totalorder %s1674_s27, %s2002_s9 }
  0x53   : > { %672 = vmatpush.bf16.msra.mxu2 %v1375_v20  ;;  %p1676_p1 = scmp.ne.s32.totalorder %s1674_s27, %s1675_s18  ;;  %p1681_p2 = scmp.lt.s32.totalorder %s1679_s14, %s1675_s18 }
  0x55   : > { %504 = vmatpush.bf16.msra.mxu0 %v1357_v9  ;;  %v1500_v9 = vld [vmem:[#allocation7 + $0x1] ss:$0 sm:$0xff]  ;;  %p1677_p4 = pnand %p1676_p1, %p1888_p3  ;;  %p1682_p9 = por %p1681_p2, %p1680_p11 }
  0x56   : > { %589 = vmatpush.bf16.msra.mxu1 %v1365_v14  ;;  %759 = vmatpush.bf16.msra.mxu3 %v1383_v36 }
  0x57   : > { %673 = vmatpush.bf16.msra.mxu2 %v1374_v29  ;;  %p1678_p8 = pneg %p1677_p4 }
  0x59   : > { %505 = vmatpush.bf16.msra.mxu0 %v1356_v10  ;;  %p1683_p10 = pnand %p1682_p9, %p1678_p8 }
  0x5a   : > { %590 = vmatpush.bf16.msra.mxu1 %v1364_v15  ;;  %760 = vmatpush.bf16.msra.mxu3 %v1382_v45 }
  0x5b   : > { %674 = vmatpush.bf16.msra.mxu2 %v1373_v30 }
  0x5d   : > { %506 = vmatpush.bf16.msra.mxu0 %v1355_v11 }
  0x5e   : > { %591 = vmatpush.bf16.msra.mxu1 %v1363_v16  ;;  %761 = vmatpush.bf16.msra.mxu3 %v1381_v46  ;;  %v1398_v16 = vld [vmem:[#allocation10 + $0x58] sm:$0xff] }
  0x5f   : > { %675 = vmatpush.bf16.msra.mxu2 %v1372_v31 }
  0x60   : > { %507 = vmatmul.bf16.vlgmr.msra.gmra.mxu0 %v1354_v12 }
  0x61   : > { %843 = vmatpush.bf16.msrb.mxu0 %v1394_v49 }
  0x62   : > { %762 = vmatpush.bf16.msra.mxu3 %v1380_v47  ;;  %930 = vmatpush.bf16.msrb.mxu1 %v1402_v4 }
  0x63   : > { %676 = vmatpush.bf16.msra.mxu2 %v1371_v32 }
  0x65   : > { %844 = vmatpush.bf16.msrb.mxu0 %v1393_v50 }
  0x66   : > { %763 = vmatpush.bf16.msra.mxu3 %v1379_v48  ;;  %931 = vmatpush.bf16.msrb.mxu1 %v1401_v5 }
  0x69   : > { %845 = vmatpush.bf16.msrb.mxu0 %v1392_v51 }
  0x6a   : > { %932 = vmatpush.bf16.msrb.mxu1 %v1400_v6 }
  0x6d   : > { %846 = vmatpush.bf16.msrb.mxu0 %v1391_v52 }
  0x6e   : > { %933 = vmatpush.bf16.msrb.mxu1 %v1399_v7 }
  0x71   : > { %847 = vmatpush.bf16.msrb.mxu0 %v1390_v0  ;;  %v1504_v0 = vld [vmem:[%s2001_s8] ss:$0 sm:$0xff] }
  0x72   : > { %934 = vmatpush.bf16.msrb.mxu1 %v1398_v16 }
  0x75   : > { %848 = vmatpush.bf16.msrb.mxu0 %v1389_v1 }
  0x76   : > { %935 = vmatpush.bf16.msrb.mxu1 %v1397_v17 }
  0x79   : > { %849 = vmatpush.bf16.msrb.mxu0 %v1388_v2 }
  0x7a   : > { %936 = vmatpush.bf16.msrb.mxu1 %v1396_v18 }
  0x7d   : > { %850 = vmatpush.bf16.msrb.mxu0 %v1387_v3 }
  0x7e   : > { %937 = vmatpush.bf16.msrb.mxu1 %v1395_v19 }
  0xdd   : > { %v508_v21 = vpop.f32.mrf.mxu0 }
  0xde   : > { %v509_v23 = vadd.f32 %v1497_v22, %v508_v21  ;;  %v1501_v21 = vld [vmem:[%s1997_s4 + $0x1] ss:$0 sm:$0xff] }
  0xe0   : > { %v513_v26 = vmax.f32 %v509_v23, 0.0 }
  0xe5   : > { %v510_v24 = vpop.f32.mrf.mxu0 }
  0xe6   : > { %v511_v25 = vadd.f32 %v1497_v22, %v510_v24 }
  0xe8   : > { %v514_v27 = vmax.f32 %v511_v25, 0.0 }
  0xea   : > { %v515_v28 = vpack.c.bf16 %v514_v27, %v513_v26 }
  0xec   : > { %592 = vmatmul.bf16.vlgmr.msra.gmra.mxu1 %v515_v28  ;;  %v1502_v28 = vld [vmem:[%s1999_s6 + $0x1] ss:$0 sm:$0xff] }
 0x169   : > { %v593_v37 = vpop.f32.mrf.mxu1 }
 0x16a   : > { %v594_v39 = vadd.f32 %v1498_v38, %v593_v37 }
 0x16c   : > { %v598_v42 = vmax.f32 %v594_v39, 0.0 }
 0x171   : > { %v595_v40 = vpop.f32.mrf.mxu1 }
 0x172   : > { %v596_v41 = vadd.f32 %v1498_v38, %v595_v40 }
 0x174   : > { %v599_v43 = vmax.f32 %v596_v41, 0.0 }
 0x176   : > { %v600_v44 = vpack.c.bf16 %v599_v43, %v598_v42 }
 0x178   : > { %677 = vmatmul.bf16.vlgmr.msra.gmra.mxu2 %v600_v44 }
 0x1fb   : > { %v678_v53 = vpop.f32.mrf.mxu2 }
 0x1fc   : > { %v679_v57 = vadd.f32 %v1499_v54, %v678_v53 }
 0x1fe   : > { %v683_v61 = vadd.f32 %v679_v57, %v423_v56 }
 0x203   : > { %v680_v59 = vpop.f32.mrf.mxu2 }
 0x204   : > { %v681_v60 = vadd.f32 %v1499_v54, %v680_v59 }
 0x206   : > { %v684_v62 = vadd.f32 %v681_v60, %v424_v58 }
 0x208   : > { %v685_v63 = vpack.c.bf16 %v684_v62, %v683_v61 }
 0x20a   : > { %764 = vmatmul.bf16.vlgmr.msra.gmra.mxu3 %v685_v63 }
 0x28d   : > { %v765_v8 = vpop.f32.mrf.mxu3 }
 0x28e   : > { %v766_v10 = vadd.f32 %v1500_v9, %v765_v8 }
 0x290   : > { %v770_v13 = vmax.f32 %v766_v10, 0.0 }
 0x295   : > { %v767_v11 = vpop.f32.mrf.mxu3 }
 0x296   : > { %v768_v12 = vadd.f32 %v1500_v9, %v767_v11 }
 0x298   : > { %v771_v14 = vmax.f32 %v768_v12, 0.0 }
 0x29a   : > { %v772_v15 = vpack.c.bf16 %v771_v14, %v770_v13 }
 0x29c   : > { %851 = vmatmul.bf16.vlgmr.msrb.gmra.mxu0 %v772_v15 }
 0x319   : > { %v852_v20 = vpop.f32.mrf.mxu0 }
 0x31a   : > { %v853_v22 = vadd.f32 %v1501_v21, %v852_v20 }
 0x31c   : > { %v857_v25 = vmax.f32 %v853_v22, 0.0 }
 0x321   : > { %v854_v23 = vpop.f32.mrf.mxu0 }
 0x322   : > { %v855_v24 = vadd.f32 %v1501_v21, %v854_v23 }
 0x324   : > { %v858_v26 = vmax.f32 %v855_v24, 0.0 }
 0x326   : > { %v859_v27 = vpack.c.bf16 %v858_v26, %v857_v25 }
 0x328   : > { %938 = vmatmul.bf16.vlgmr.msrb.gmra.mxu1 %v859_v27 }
 0x3a5   : > { %v939_v29 = vpop.f32.mrf.mxu1 }
 0x3a6   : > { %v940_v30 = vadd.f32 %v1502_v28, %v939_v29 }
 0x3a8   : > { %v944_v31 = vadd.f32 %v940_v30, %v683_v61  ;;  %v1503_v61 = vld [vmem:[%s2000_s7] ss:$0 sm:$0xff] }
 0x3aa   : > { %946 = vadd.xlane.f32.xlu0 %v944_v31  ;;  %v952_v32 = vmul.f32 %v944_v31, %v944_v31 }
 0x3ac   : > { %954 = vadd.xlane.f32.xlu1 %v952_v32 }
 0x3ad   : > { %v941_v33 = vpop.f32.mrf.mxu1 }
 0x3ae   : > { %v942_v34 = vadd.f32 %v1502_v28, %v941_v33 }
 0x3b0   : > { %v945_v35 = vadd.f32 %v942_v34, %v684_v62 }
 0x3b2   : > { %948 = vadd.xlane.f32.xlu0 %v945_v35  ;;  %v953_v36 = vmul.f32 %v945_v35, %v945_v35 }
 0x3b4   : > { %956 = vadd.xlane.f32.xlu1 %v953_v36 }
 0x41d   : > { %v947_v37 = vpop.xlane.xlu0 %946 }
 0x41e   : > { %v950_v38 = vmul.f32 0.0078125, %v947_v37 }
 0x41f   : > { %v955_v39 = vpop.xlane.xlu1 %954 }
 0x420   : > { %v960_v40 = vmul.f32 %v950_v38, %v950_v38  ;;  %v958_v41 = vmul.f32 0.0078125, %v955_v39  ;;  %v988_v60 = vsub.f32 %v944_v31, %v950_v38 }
 0x422   : > { %v962_v42 = vsub.f32 %v958_v41, %v960_v40 }
 0x424   : > { %v964_v43 = vmax.f32 %v962_v42, 0.0 }
 0x425   : > { %v949_v44 = vpop.xlane.xlu0 %948 }
 0x426   : > { %v966_v45 = vadd.f32 1e-05, %v964_v43  ;;  %v951_v46 = vmul.f32 0.0078125, %v949_v44 }
 0x427   : > { %v957_v47 = vpop.xlane.xlu1 %956 }
 0x428   : > { %1505 = vrsqrt.f32 %v966_v45  ;;  %v961_v48 = vmul.f32 %v951_v46, %v951_v46  ;;  %v959_v49 = vmul.f32 0.0078125, %v957_v47  ;;  %vm974_vm1 = vweird.f32 %v966_v45 }
 0x429   : > { %v989_v8 = vsub.f32 %v945_v35, %v951_v46 }
 0x42a   : > { %v963_v50 = vsub.f32 %v959_v49, %v961_v48 }
 0x42c   : > { %v965_v51 = vmax.f32 %v963_v50, 0.0 }
 0x42e   : > { %v1506_v52 = vpop.eup %1505  ;;  %v967_v54 = vadd.f32 1e-05, %v965_v51 }
 0x42f   : > { %v969_v53 = vmul.f32 %v1506_v52, %v966_v45  ;;  %vm975_vm0 = vweird.f32 %v1506_v52 }
 0x430   : > { %1507 = vrsqrt.f32 %v967_v54  ;;  %vm976_vm2 = vmor %vm974_vm1, %vm975_vm0  ;;  %vm984_vm4 = vweird.f32 %v967_v54 }
 0x431   : > { %v970_v55 = vmul.f32 %v1506_v52, %v969_v53 }
 0x433   : > { %v971_v56 = vmul.f32 0.5, %v970_v55 }
 0x435   : > { %v972_v57 = vsub.f32 1.5, %v971_v56 }
 0x436   : > { %v1508_v58 = vpop.eup %1507 }
 0x437   : > { %v973_v59 = vmul.f32 %v1506_v52, %v972_v57  ;;  %v979_v62 = vmul.f32 %v1508_v58, %v967_v54  ;;  %vm985_vm3 = vweird.f32 %v1508_v58 }
 0x438   : > { %vm986_vm5 = vmor %vm984_vm4, %vm985_vm3 }
 0x439   : > { %v977_v63 = vsel %vm976_vm2, %v1506_v52, %v973_v59  ;;  %v980_v2 = vmul.f32 %v1508_v58, %v979_v62 }
 0x43a   : > { %v990_v1 = vmul.f32 %v988_v60, %v977_v63 }
 0x43b   : > { %v981_v4 = vmul.f32 0.5, %v980_v2 }
 0x43c   : > { %v996_v3 = vmul.f32 %v1503_v61, %v990_v1 }
 0x43d   : > { %v982_v6 = vsub.f32 1.5, %v981_v4 }
 0x43e   : > { %v1002_v5 = vadd.f32 %v1504_v0, %v996_v3 }
 0x43f   : > { %v983_v7 = vmul.f32 %v1508_v58, %v982_v6 }
 0x440   : > { %1004 = vst [vmem:[%s418_s1] sm:$0xff] %v1002_v5 }
 0x441   : > { %v987_v9 = vsel %vm986_vm5, %v1508_v58, %v983_v7 }
 0x442   : > { %v991_v10 = vmul.f32 %v989_v8, %v987_v9 }
 0x444   : > { %v997_v11 = vmul.f32 %v1503_v61, %v991_v10 }
 0x446   : > { %v1003_v12 = vadd.f32 %v1504_v0, %v997_v11 }
 0x448   : > { %1005 = vst [vmem:[%s418_s1 + $0x8] sm:$0xff] %v1003_v12 }
 0x449   : > { %1686 = shalt.err (!%p1683_p10)
}
 0x44a   : > { %s1743_s29 = smov 128   ;;  %s1744_s17 = smov 8  }
 0x44b   : > { %1422 = dma.vmem_to_hbm [thread:$0]  (%p1888_p3), %s1020_s25, 256, %s1022_s24, %s1007_s13, %s1743_s29, %s1743_s29, %s1744_s17  }
 0x44c PF: > { %s1036_s1 = sand.u32 1, %s1721_s30   ;;  %p2019_p12 = scmp.ge.s32.totalorder %s1733_s12, 2 }
 0x44d   : > { %s1037_s15 = scalar_lea.sflag [#allocation4], %s1036_s1 }
 0x44e   : > { %p1442_p13 = pnand %p2019_p12, %p1830_p6 }
 0x450   : > { %p1443_p0 = pneg %p1442_p13 }
 0x452   : > { %1716 = dma.done.wait (%p1443_p0), %s1037_s15, 256  }
 0x453   : > { %1718 = vsyncadd (%p1443_p0), %s1037_s15, 4294967040  ;;  %p24_p5 = scmp.ge.s32.totalorder %s1878_s19, 4   ;;  %s2020_s30 = smov %s1725_s10 }
 0x454   : > { %s2021_s10 = smov %s1729_s11  ;;  %s2022_s11 = smov %s1894_s22 }
 0x455   : > { %s2023_s12 = smov %s1878_s19  ;;  %26 = sbr.rel (!%p24_p5) target bundleno = 11 (0xb), region = 123 }
 0x45a   :  { %1043 = vsyncpa [#allocation3], 1 }
 0x45b   :  { %1045 = vsyncpa [#allocation3 + $0x1], 1 }
 0x45c   :  { %1046 = vsyncpa [#allocation6], 1 }
 0x45d   :  { %1047 = vsyncpa [#allocation9], 1 }
 0x45e   :  { %1048 = vsyncpa [#allocation4], 1 }
 0x45f   :  { %1050 = vsyncpa [#allocation4 + $0x1], 1 }

// kernel: tpu_custom_call.1
= control target key start
LH: loop header
LB: loop body
LE: loop exit
PB: predicated region body
PF: predicated region fallthrough
CT: control target
= control target key end

     0   :  { %s1993_s0 = inlined_call_operand.hbm [shape: bf16[32,128], index: 0, kind: input, shape index: {}]   ;;  %s1994_s1 = inlined_call_operand.hbm [shape: bf16[2,128,128], index: 1, kind: input, shape index: {}]   ;;  %s1995_s2 = inlined_call_operand.hbm [shape: f32[2,1,128], index: 2, kind: input, shape index: {}]   ;;  %s1996_s3 = inlined_call_operand.hbm [shape: bf16[2,128,128], index: 3, kind: input, shape index: {}]   ;;  %s1997_s4 = inlined_call_operand.vmem [shape: f32[2,1,128], index: 4, kind: input, shape index: {}]   ;;  %s1998_s5 = inlined_call_operand.hbm [shape: bf16[2,128,128], index: 5, kind: input, shape index: {}]   ;;  %s1999_s6 = inlined_call_operand.vmem [shape: f32[2,1,128], index: 6, kind: input, shape index: {}]   ;;  %s2000_s7 = inlined_call_operand.vmem [shape: f32[1,128], index: 7, kind: input, shape index: {}]   ;;  %s2001_s8 = inlined_call_operand.vmem [shape: f32[1,128], index: 8, kind: input, shape index: {}]   ;;  %s2002_s9 = inlined_call_operand.hbm [shape: f32[32,128], index: 9, kind: output, shape index: {}]  }
   0x1   :  { %2005 = sst [smem:[#allocation16_spill]] %s1994_s1 }
   0x2   :  { %2006 = sst [smem:[#allocation17_spill]] %s1995_s2 }
   0x3   :  { %2007 = sst [smem:[#allocation18_spill]] %s1996_s3 }
   0x4   :  { %14 = vsyncpa [#allocation3], 0 }
   0x5   :  { %16 = vsyncpa [#allocation3 + $0x1], 0 }
   0x6   :  { %17 = vsyncpa [#allocation6], 0 }
   0x7   :  { %18 = vsyncpa [#allocation9], 0 }
   0x8   :  { %19 = vsyncpa [#allocation4], 0 }
   0x9   :  { %21 = vsyncpa [#allocation4 + $0x1], 0  ;;  %s1795_s30 = smov 0   ;;  %s1797_s10 = smov 0  }
   0xa   :  { %s1799_s11 = smov 0   ;;  %s1801_s12 = smov 0  }
   0xb LB: > { %s1816_s13 = sadd.s32 4294967295, %s1733_s12   ;;  %s1133_s14 = sadd.s32 4294967294, %s1733_s12   ;;  %s1733_s12 = sphi %s1801_s12, %s2023_s12   ;;  %s1729_s11 = sphi %s1799_s11, %s2022_s11   ;;  %s1725_s10 = sphi %s1797_s10, %s2021_s10   ;;  %s1721_s30 = sphi %s1795_s30, %s2020_s30  }
   0xc   : > { %p47_p0 = scmp.ne.s32.totalorder %s1725_s10, %s1721_s30  ;;  %p48_p1 = scmp.eq.s32.totalorder %s1816_s13, 0 }
   0xd   : > { %p239_p2 = scmp.eq.s32.totalorder %s1816_s13, 1  ;;  %p245_p3 = scmp.eq.s32.totalorder %s1133_s14, 1 }
   0xe   : > { %p1825_p4 = por %p48_p1, %p47_p0  ;;  %p1134_p5 = scmp.ge.s32.totalorder %s1733_s12, 1 }
   0xf   : > { %p1830_p6 = por %p245_p3, %p47_p0  ;;  %p252_p7 = scmp.lt.s32.totalorder %s1733_s12, 3 }
  0x10   : > { %s2010_s1 = sld [smem:[#allocation16_spill]]  ;;  %s1735_s21 = smov [#allocation5]  }
  0x11   : > { %p1838_p8 = pnand %p1134_p5, %p252_p7  ;;  %s265_s22 = sshll.u32 %s1735_s21, 4  ;;  %s266_s22 = int_to_ptr.vmem [resolvable:$true] %s265_s22 }
  0x12   : > { %s2013_s3 = sld [smem:[#allocation18_spill]]  ;;  %s2003_s27 = smov 64  }
  0x13   : > { %p1424_p9 = pneg %p1838_p8  ;;  %s2004_s28 = smov 4  }
  0x14   : > { %s1738_s29 = smov [#allocation8]   ;;  %s2014_s2 = sld [smem:[#allocation17_spill]] }
  0x15   : > { %p1846_p10 = pnand %p1424_p9, %p48_p1  ;;  %s293_s14 = sshll.u32 %s1738_s29, 4  ;;  %s294_s14 = int_to_ptr.vmem [resolvable:$true] %s293_s14 }
  0x16   : > { %s263_s19 = sshll.u32 %s2010_s1, 4  ;;  %s308_s29 = sshll.u32 %s1998_s5, 4  ;;  %s264_s19 = int_to_ptr.hbm [resolvable:$true] %s263_s19  ;;  %s309_s29 = int_to_ptr.hbm [resolvable:$true] %s308_s29 }
  0x17   : > { %1427 = dma.hbm_to_vmem [thread:$0]  (!%p1846_p10), %s264_s19, 2048, %s266_s22, [#allocation6], %s2003_s27, %s2003_s27, %s2004_s28  }
  0x18   : > { %s291_s26 = sshll.u32 %s2013_s3, 4  ;;  %s1739_s19 = smov [#allocation7]   ;;  %s292_s26 = int_to_ptr.hbm [resolvable:$true] %s291_s26 }
  0x19   : > { %1433 = dma.hbm_to_vmem [thread:$0]  (!%p1846_p10), %s292_s26, 2048, %s294_s14, [#allocation9], %s2003_s27, %s2003_s27, %s2004_s28  }
  0x1a   : > { %s277_s21 = sshll.u32 %s2014_s2, 4  ;;  %s279_s22 = sshll.u32 %s1739_s19, 4  ;;  %s278_s21 = int_to_ptr.hbm [resolvable:$true] %s277_s21  ;;  %s280_s22 = int_to_ptr.vmem [resolvable:$true] %s279_s22 }
  0x1b   : > { %s1740_s17 = smov 16   ;;  %s1741_s18 = smov 1  }
  0x1c   : > { %1430 = dma.hbm_to_vmem [thread:$0]  (!%p1846_p10), %s278_s21, 32, %s280_s22, [#allocation6], %s1740_s17, %s1740_s17, %s1741_s18  }
  0x1d   : > { %s1742_s26 = smov [#allocation10]   ;;  %s1878_s19 = sadd.s32 1, %s1733_s12  }
  0x1e   : > { %s310_s14 = sshll.u32 %s1742_s26, 4  ;;  %s34_s24 = sadd.s32 1, %s1729_s11  ;;  %s311_s14 = int_to_ptr.vmem [resolvable:$true] %s310_s14 }
  0x1f   : > { %1436 = dma.hbm_to_vmem [thread:$0]  (!%p1846_p10), %s309_s29, 2048, %s311_s14, [#allocation9], %s2003_s27, %s2003_s27, %s2004_s28  }
  0x20   : > { %s31_s25 = ssub.s32 %s1733_s12, %s1878_s19  ;;  %p41_p12 = scmp.ne.s32.totalorder %s1729_s11, %s1725_s10 }
  0x21   : > { %p32_p13 = scmp.eq.s32.totalorder %s31_s25, 0  ;;  %p42_p0 = scmp.eq.s32.totalorder %s1733_s12, 0 }
  0x22   : > { %p1888_p3 = por %p239_p2, %p41_p12  ;;  %p1449_p5 = scmp.lt.s32.totalorder %s1733_s12, 2 }
  0x23   : > { %s1894_s22 = scalar_select %p32_p13, %s1729_s11, %s34_s24  }
  0x24   : > { %p43_p7 = por %p42_p0, %p41_p12  ;;  %s333_s23 = sand.u32 1, %s1729_s11  }
  0x25   : > { %s1140_s17 = sshll.u32 %s333_s23, 3  ;;  %s1353_s29 = sshll.u32 %s1733_s12, 3 }
  0x26   : > { %s342_s14 = scalar_lea.hbm %s1993_s0, %s1353_s29  ;;  %s337_s27 = scalar_lea.vmem [#allocation2], %s1140_s17 }
  0x27   : > { %s345_s28 = sshll.u32 %s337_s27, 4  ;;  %s343_s25 = sshll.u32 %s342_s14, 4  ;;  %s346_s28 = int_to_ptr.vmem [resolvable:$true] %s345_s28  ;;  %s344_s25 = int_to_ptr.hbm [resolvable:$true] %s343_s25 }
  0x28   : > { %p1901_p2 = pnand %p1449_p5, %p43_p7  ;;  %s334_s24 = scalar_lea.sflag [#allocation3], %s333_s23 }
  0x29   : > { %s1629_s2 = sshra.s32 %s344_s25, 4  ;;  %s1636_s27 = scalar_lea.hbm %s1993_s0, 16  ;;  %s1630_s2 = int_to_ptr.hbm [resolvable:$true] %s1629_s2 }
  0x2a   : > { %s1631_s3 = scalar_lea.hbm %s1630_s2, 8  ;;  %p1633_p10 = pneg %p1901_p2 }
  0x2b   : > { %p1632_p9 = scmp.ne.s32.totalorder %s1630_s2, %s1631_s3  ;;  %p1637_p0 = scmp.lt.s32.totalorder %s1630_s2, %s1993_s0 }
  0x2c   : > { %p1638_p5 = scmp.lt.s32.totalorder %s1636_s27, %s1631_s3 }
  0x2d   : > { %p1634_p12 = pnand %p1633_p10, %p1632_p9 }
  0x2e   : > { %p1639_p7 = por %p1638_p5, %p1637_p0 }
  0x2f   : > { %p1635_p13 = pneg %p1634_p12 }
  0x31   : > { %p1640_p11 = pnand %p1639_p7, %p1635_p13 }
  0x33   : > { %1643 = shalt.err (!%p1640_p11)
}
  0x34   : > { %s2017_s23 = smov 4   ;;  %s2018_s14 = smov 64  }
  0x35   : > { %1440 = dma.hbm_to_vmem [thread:$0]  (!%p1901_p2), %s344_s25, 128, %s346_s28, %s334_s24, %s2018_s14, %s2018_s14, %s2017_s23  }
  0x36   : > { %357 = sbr.rel (%p1838_p8) target bundleno = 1100 (0x44c), region = 56  ;;  %s1921_s29 = sand.u32 (!%p1838_p8), 1, %s1725_s10  }
  0x37   : > { %s1144_s2 = sshll.u32 (!%p1838_p8), %s1921_s29, 3  ;;  %s360_s3 = scalar_lea.sflag (!%p1838_p8), [#allocation3], %s1921_s29 }
  0x38   : > { %s1925_s17 = scalar_lea.vmem (!%p1838_p8), [#allocation2], %s1144_s2 }
  0x3b   : > { %1704 = dma.done.wait (%p1825_p4), %s360_s3, 128  }
  0x3c   : > { %1706 = vsyncadd (%p1825_p4), %s360_s3, 4294967168 }
  0x3d   : > { %1708 = dma.done.wait (%p48_p1), [#allocation6], 2080  }
  0x3e   : > { %1710 = vsyncadd (%p48_p1), [#allocation6], 4294965216 }
  0x3f   : > { %1712 = dma.done.wait (%p48_p1), [#allocation9], 4096  }
  0x40   : > { %1714 = vsyncadd (%p48_p1), [#allocation9], 4294963200  ;;  %v1362_v0 = vld [vmem:[#allocation5 + $0x38] sm:$0xff]  ;;  %v1361_v1 = vld [vmem:[#allocation5 + $0x30] sm:$0xff]  ;;  %s1149_s3 = sshll.u32 %s1921_s29, 4  ;;  %s1679_s14 = scalar_lea.hbm %s2002_s9, 32 }
  0x41   : > { %499 = vmatpush.bf16.msra.mxu0 %v1362_v0  ;;  %v1370_v2 = vld [vmem:[#allocation8 + $0x38] sm:$0xff]  ;;  %v1360_v3 = vld [vmem:[#allocation5 + $0x28] sm:$0xff]  ;;  %v1369_v4 = vld [vmem:[#allocation8 + $0x30] sm:$0xff]  ;;  %s418_s1 = scalar_lea.vmem [#allocation11], %s1149_s3 }
  0x42   : > { %584 = vmatpush.bf16.msra.mxu1 %v1370_v2  ;;  %v1368_v5 = vld [vmem:[#allocation8 + $0x28] sm:$0xff]  ;;  %v1359_v6 = vld [vmem:[#allocation5 + $0x20] sm:$0xff]  ;;  %v1358_v8 = vld [vmem:[#allocation5 + $0x18] sm:$0xff]  ;;  %s1019_s25 = sshll.u32 %s418_s1, 4  ;;  %s1020_s25 = int_to_ptr.vmem [resolvable:$true] %s1019_s25 }
  0x43   : > { %v1367_v7 = vld [vmem:[#allocation8 + $0x20] sm:$0xff]  ;;  %v1357_v9 = vld [vmem:[#allocation5 + $0x10] sm:$0xff]  ;;  %v1366_v13 = vld [vmem:[#allocation8 + $0x18] sm:$0xff] }
  0x44   : > { %v1356_v10 = vld [vmem:[#allocation5 + $0x8] sm:$0xff]  ;;  %v1355_v11 = vld [vmem:[#allocation5] sm:$0xff]  ;;  %v1354_v12 = vld [vmem:[%s1925_s17] sm:$0xff] }
  0x45   : > { %500 = vmatpush.bf16.msra.mxu0 %v1361_v1  ;;  %v1365_v14 = vld [vmem:[#allocation8 + $0x10] sm:$0xff]  ;;  %v1364_v15 = vld [vmem:[#allocation8 + $0x8] sm:$0xff]  ;;  %v1363_v16 = vld [vmem:[#allocation8] sm:$0xff] }
  0x46   : > { %585 = vmatpush.bf16.msra.mxu1 %v1369_v4  ;;  %v1378_v17 = vld [vmem:[#allocation10 + $0x38] sm:$0xff]  ;;  %v1377_v18 = vld [vmem:[#allocation10 + $0x30] sm:$0xff]  ;;  %v1376_v19 = vld [vmem:[#allocation10 + $0x28] sm:$0xff] }
  0x47   : > { %669 = vmatpush.bf16.msra.mxu2 %v1378_v17  ;;  %v1375_v20 = vld [vmem:[#allocation10 + $0x20] sm:$0xff]  ;;  %v1497_v22 = vld [vmem:[#allocation7] ss:$0 sm:$0xff]  ;;  %v1373_v30 = vld [vmem:[#allocation10 + $0x10] sm:$0xff] }
  0x48   : > { %v1374_v29 = vld [vmem:[#allocation10 + $0x18] sm:$0xff]  ;;  %v1372_v31 = vld [vmem:[#allocation10 + $0x8] sm:$0xff]  ;;  %v1371_v32 = vld [vmem:[#allocation10] sm:$0xff] }
  0x49   : > { %501 = vmatpush.bf16.msra.mxu0 %v1360_v3  ;;  %v1386_v33 = vld [vmem:[#allocation5 + $0x78] sm:$0xff]  ;;  %v1385_v34 = vld [vmem:[#allocation5 + $0x70] sm:$0xff]  ;;  %v1384_v35 = vld [vmem:[#allocation5 + $0x68] sm:$0xff] }
  0x4a   : > { %586 = vmatpush.bf16.msra.mxu1 %v1368_v5  ;;  %756 = vmatpush.bf16.msra.mxu3 %v1386_v33  ;;  %v1383_v36 = vld [vmem:[#allocation5 + $0x60] sm:$0xff]  ;;  %v1498_v38 = vld [vmem:[%s1997_s4] ss:$0 sm:$0xff]  ;;  %v1382_v45 = vld [vmem:[#allocation5 + $0x58] sm:$0xff] }
  0x4b   : > { %670 = vmatpush.bf16.msra.mxu2 %v1377_v18  ;;  %v1381_v46 = vld [vmem:[#allocation5 + $0x50] sm:$0xff]  ;;  %v1380_v47 = vld [vmem:[#allocation5 + $0x48] sm:$0xff]  ;;  %v1379_v48 = vld [vmem:[#allocation5 + $0x40] sm:$0xff] }
  0x4c   : > { %v1394_v49 = vld [vmem:[#allocation8 + $0x78] sm:$0xff]  ;;  %v1393_v50 = vld [vmem:[#allocation8 + $0x70] sm:$0xff]  ;;  %v1392_v51 = vld [vmem:[#allocation8 + $0x68] sm:$0xff] }
  0x4d   : > { %502 = vmatpush.bf16.msra.mxu0 %v1359_v6  ;;  %v1391_v52 = vld [vmem:[#allocation8 + $0x60] sm:$0xff]  ;;  %v1499_v54 = vld [vmem:[%s1999_s6] ss:$0 sm:$0xff]  ;;  %v1390_v0 = vld [vmem:[#allocation8 + $0x58] sm:$0xff] }
  0x4e   : > { %587 = vmatpush.bf16.msra.mxu1 %v1367_v7  ;;  %757 = vmatpush.bf16.msra.mxu3 %v1385_v34  ;;  %v421_v55 = vld [vmem:[%s1925_s17] sm:$0xff]   ;;  %v1387_v3 = vld [vmem:[#allocation8 + $0x40] sm:$0xff]  ;;  %s1403_s17 = sshll.u32 %s1816_s13, 4  ;;  %s1007_s13 = scalar_lea.sflag [#allocation4], %s1921_s29 }
  0x4f   : > { %671 = vmatpush.bf16.msra.mxu2 %v1376_v19  ;;  %v423_v56 = vunpack.c.l.bf16 %v421_v55  ;;  %v424_v58 = vunpack.c.h.bf16 %v421_v55  ;;  %v1389_v1 = vld [vmem:[#allocation8 + $0x50] sm:$0xff]  ;;  %v1388_v2 = vld [vmem:[#allocation8 + $0x48] sm:$0xff]  ;;  %v1402_v4 = vld [vmem:[#allocation10 + $0x78] sm:$0xff]  ;;  %s1018_s28 = scalar_lea.hbm %s2002_s9, %s1403_s17 }
  0x50   : > { %v1401_v5 = vld [vmem:[#allocation10 + $0x70] sm:$0xff]  ;;  %v1400_v6 = vld [vmem:[#allocation10 + $0x68] sm:$0xff]  ;;  %v1399_v7 = vld [vmem:[#allocation10 + $0x60] sm:$0xff]  ;;  %s1021_s24 = sshll.u32 %s1018_s28, 4  ;;  %s1022_s24 = int_to_ptr.hbm [resolvable:$true] %s1021_s24 }
  0x51   : > { %503 = vmatpush.bf16.msra.mxu0 %v1358_v8  ;;  %v1397_v17 = vld [vmem:[#allocation10 + $0x50] sm:$0xff]  ;;  %v1396_v18 = vld [vmem:[#allocation10 + $0x48] sm:$0xff]  ;;  %v1395_v19 = vld [vmem:[#allocation10 + $0x40] sm:$0xff]  ;;  %s1673_s27 = sshra.s32 %s1022_s24, 4  ;;  %s1674_s27 = int_to_ptr.hbm [resolvable:$true] %s1673_s27 }
  0x52   : > { %588 = vmatpush.bf16.msra.mxu1 %v1366_v13  ;;  %758 = vmatpush.bf16.msra.mxu3 %v1384_v35  ;;  %s1675_s18 = scalar_lea.hbm %s1674_s27, 16  ;;  %p1680_p11 = scmp.lt.s32.totalorder %s1674_s27, %s2002_s9 }
  0x53   : > { %672 = vmatpush.bf16.msra.mxu2 %v1375_v20  ;;  %p1676_p1 = scmp.ne.s32.totalorder %s1674_s27, %s1675_s18  ;;  %p1681_p2 = scmp.lt.s32.totalorder %s1679_s14, %s1675_s18 }
  0x55   : > { %504 = vmatpush.bf16.msra.mxu0 %v1357_v9  ;;  %v1500_v9 = vld [vmem:[#allocation7 + $0x1] ss:$0 sm:$0xff]  ;;  %p1677_p4 = pnand %p1676_p1, %p1888_p3  ;;  %p1682_p9 = por %p1681_p2, %p1680_p11 }
  0x56   : > { %589 = vmatpush.bf16.msra.mxu1 %v1365_v14  ;;  %759 = vmatpush.bf16.msra.mxu3 %v1383_v36 }
  0x57   : > { %673 = vmatpush.bf16.msra.mxu2 %v1374_v29  ;;  %p1678_p8 = pneg %p1677_p4 }
  0x59   : > { %505 = vmatpush.bf16.msra.mxu0 %v1356_v10  ;;  %p1683_p10 = pnand %p1682_p9, %p1678_p8 }
  0x5a   : > { %590 = vmatpush.bf16.msra.mxu1 %v1364_v15  ;;  %760 = vmatpush.bf16.msra.mxu3 %v1382_v45 }
  0x5b   : > { %674 = vmatpush.bf16.msra.mxu2 %v1373_v30 }
  0x5d   : > { %506 = vmatpush.bf16.msra.mxu0 %v1355_v11 }
  0x5e   : > { %591 = vmatpush.bf16.msra.mxu1 %v1363_v16  ;;  %761 = vmatpush.bf16.msra.mxu3 %v1381_v46  ;;  %v1398_v16 = vld [vmem:[#allocation10 + $0x58] sm:$0xff] }
  0x5f   : > { %675 = vmatpush.bf16.msra.mxu2 %v1372_v31 }
  0x60   : > { %507 = vmatmul.bf16.vlgmr.msra.gmra.mxu0 %v1354_v12 }
  0x61   : > { %843 = vmatpush.bf16.msrb.mxu0 %v1394_v49 }
  0x62   : > { %762 = vmatpush.bf16.msra.mxu3 %v1380_v47  ;;  %930 = vmatpush.bf16.msrb.mxu1 %v1402_v4 }
  0x63   : > { %676 = vmatpush.bf16.msra.mxu2 %v1371_v32 }
  0x65   : > { %844 = vmatpush.bf16.msrb.mxu0 %v1393_v50 }
  0x66   : > { %763 = vmatpush.bf16.msra.mxu3 %v1379_v48  ;;  %931 = vmatpush.bf16.msrb.mxu1 %v1401_v5 }
  0x69   : > { %845 = vmatpush.bf16.msrb.mxu0 %v1392_v51 }
  0x6a   : > { %932 = vmatpush.bf16.msrb.mxu1 %v1400_v6 }
  0x6d   : > { %846 = vmatpush.bf16.msrb.mxu0 %v1391_v52 }
  0x6e   : > { %933 = vmatpush.bf16.msrb.mxu1 %v1399_v7 }
  0x71   : > { %847 = vmatpush.bf16.msrb.mxu0 %v1390_v0  ;;  %v1504_v0 = vld [vmem:[%s2001_s8] ss:$0 sm:$0xff] }
  0x72   : > { %934 = vmatpush.bf16.msrb.mxu1 %v1398_v16 }
  0x75   : > { %848 = vmatpush.bf16.msrb.mxu0 %v1389_v1 }
  0x76   : > { %935 = vmatpush.bf16.msrb.mxu1 %v1397_v17 }
  0x79   : > { %849 = vmatpush.bf16.msrb.mxu0 %v1388_v2 }
  0x7a   : > { %936 = vmatpush.bf16.msrb.mxu1 %v1396_v18 }
  0x7d   : > { %850 = vmatpush.bf16.msrb.mxu0 %v1387_v3 }
  0x7e   : > { %937 = vmatpush.bf16.msrb.mxu1 %v1395_v19 }
  0xdd   : > { %v508_v21 = vpop.f32.mrf.mxu0 }
  0xde   : > { %v509_v23 = vadd.f32 %v1497_v22, %v508_v21  ;;  %v1501_v21 = vld [vmem:[%s1997_s4 + $0x1] ss:$0 sm:$0xff] }
  0xe0   : > { %v513_v26 = vmax.f32 %v509_v23, 0.0 }
  0xe5   : > { %v510_v24 = vpop.f32.mrf.mxu0 }
  0xe6   : > { %v511_v25 = vadd.f32 %v1497_v22, %v510_v24 }
  0xe8   : > { %v514_v27 = vmax.f32 %v511_v25, 0.0 }
  0xea   : > { %v515_v28 = vpack.c.bf16 %v514_v27, %v513_v26 }
  0xec   : > { %592 = vmatmul.bf16.vlgmr.msra.gmra.mxu1 %v515_v28  ;;  %v1502_v28 = vld [vmem:[%s1999_s6 + $0x1] ss:$0 sm:$0xff] }
 0x169   : > { %v593_v37 = vpop.f32.mrf.mxu1 }
 0x16a   : > { %v594_v39 = vadd.f32 %v1498_v38, %v593_v37 }
 0x16c   : > { %v598_v42 = vmax.f32 %v594_v39, 0.0 }
 0x171   : > { %v595_v40 = vpop.f32.mrf.mxu1 }
 0x172   : > { %v596_v41 = vadd.f32 %v1498_v38, %v595_v40 }
 0x174   : > { %v599_v43 = vmax.f32 %v596_v41, 0.0 }
 0x176   : > { %v600_v44 = vpack.c.bf16 %v599_v43, %v598_v42 }
 0x178   : > { %677 = vmatmul.bf16.vlgmr.msra.gmra.mxu2 %v600_v44 }
 0x1fb   : > { %v678_v53 = vpop.f32.mrf.mxu2 }
 0x1fc   : > { %v679_v57 = vadd.f32 %v1499_v54, %v678_v53 }
 0x1fe   : > { %v683_v61 = vadd.f32 %v679_v57, %v423_v56 }
 0x203   : > { %v680_v59 = vpop.f32.mrf.mxu2 }
 0x204   : > { %v681_v60 = vadd.f32 %v1499_v54, %v680_v59 }
 0x206   : > { %v684_v62 = vadd.f32 %v681_v60, %v424_v58 }
 0x208   : > { %v685_v63 = vpack.c.bf16 %v684_v62, %v683_v61 }
 0x20a   : > { %764 = vmatmul.bf16.vlgmr.msra.gmra.mxu3 %v685_v63 }
 0x28d   : > { %v765_v8 = vpop.f32.mrf.mxu3 }
 0x28e   : > { %v766_v10 = vadd.f32 %v1500_v9, %v765_v8 }
 0x290   : > { %v770_v13 = vmax.f32 %v766_v10, 0.0 }
 0x295   : > { %v767_v11 = vpop.f32.mrf.mxu3 }
 0x296   : > { %v768_v12 = vadd.f32 %v1500_v9, %v767_v11 }
 0x298   : > { %v771_v14 = vmax.f32 %v768_v12, 0.0 }
 0x29a   : > { %v772_v15 = vpack.c.bf16 %v771_v14, %v770_v13 }
 0x29c   : > { %851 = vmatmul.bf16.vlgmr.msrb.gmra.mxu0 %v772_v15 }
 0x319   : > { %v852_v20 = vpop.f32.mrf.mxu0 }
 0x31a   : > { %v853_v22 = vadd.f32 %v1501_v21, %v852_v20 }
 0x31c   : > { %v857_v25 = vmax.f32 %v853_v22, 0.0 }
 0x321   : > { %v854_v23 = vpop.f32.mrf.mxu0 }
 0x322   : > { %v855_v24 = vadd.f32 %v1501_v21, %v854_v23 }
 0x324   : > { %v858_v26 = vmax.f32 %v855_v24, 0.0 }
 0x326   : > { %v859_v27 = vpack.c.bf16 %v858_v26, %v857_v25 }
 0x328   : > { %938 = vmatmul.bf16.vlgmr.msrb.gmra.mxu1 %v859_v27 }
 0x3a5   : > { %v939_v29 = vpop.f32.mrf.mxu1 }
 0x3a6   : > { %v940_v30 = vadd.f32 %v1502_v28, %v939_v29 }
 0x3a8   : > { %v944_v31 = vadd.f32 %v940_v30, %v683_v61  ;;  %v1503_v61 = vld [vmem:[%s2000_s7] ss:$0 sm:$0xff] }
 0x3aa   : > { %946 = vadd.xlane.f32.xlu0 %v944_v31  ;;  %v952_v32 = vmul.f32 %v944_v31, %v944_v31 }
 0x3ac   : > { %954 = vadd.xlane.f32.xlu1 %v952_v32 }
 0x3ad   : > { %v941_v33 = vpop.f32.mrf.mxu1 }
 0x3ae   : > { %v942_v34 = vadd.f32 %v1502_v28, %v941_v33 }
 0x3b0   : > { %v945_v35 = vadd.f32 %v942_v34, %v684_v62 }
 0x3b2   : > { %948 = vadd.xlane.f32.xlu0 %v945_v35  ;;  %v953_v36 = vmul.f32 %v945_v35, %v945_v35 }
 0x3b4   : > { %956 = vadd.xlane.f32.xlu1 %v953_v36 }
 0x41d   : > { %v947_v37 = vpop.xlane.xlu0 %946 }
 0x41e   : > { %v950_v38 = vmul.f32 0.0078125, %v947_v37 }
 0x41f   : > { %v955_v39 = vpop.xlane.xlu1 %954 }
 0x420   : > { %v960_v40 = vmul.f32 %v950_v38, %v950_v38  ;;  %v958_v41 = vmul.f32 0.0078125, %v955_v39  ;;  %v988_v60 = vsub.f32 %v944_v31, %v950_v38 }
 0x422   : > { %v962_v42 = vsub.f32 %v958_v41, %v960_v40 }
 0x424   : > { %v964_v43 = vmax.f32 %v962_v42, 0.0 }
 0x425   : > { %v949_v44 = vpop.xlane.xlu0 %948 }
 0x426   : > { %v966_v45 = vadd.f32 1e-05, %v964_v43  ;;  %v951_v46 = vmul.f32 0.0078125, %v949_v44 }
 0x427   : > { %v957_v47 = vpop.xlane.xlu1 %956 }
 0x428   : > { %1505 = vrsqrt.f32 %v966_v45  ;;  %v961_v48 = vmul.f32 %v951_v46, %v951_v46  ;;  %v959_v49 = vmul.f32 0.0078125, %v957_v47  ;;  %vm974_vm1 = vweird.f32 %v966_v45 }
 0x429   : > { %v989_v8 = vsub.f32 %v945_v35, %v951_v46 }
 0x42a   : > { %v963_v50 = vsub.f32 %v959_v49, %v961_v48 }
 0x42c   : > { %v965_v51 = vmax.f32 %v963_v50, 0.0 }
 0x42e   : > { %v1506_v52 = vpop.eup %1505  ;;  %v967_v54 = vadd.f32 1e-05, %v965_v51 }
 0x42f   : > { %v969_v53 = vmul.f32 %v1506_v52, %v966_v45  ;;  %vm975_vm0 = vweird.f32 %v1506_v52 }
 0x430   : > { %1507 = vrsqrt.f32 %v967_v54  ;;  %vm976_vm2 = vmor %vm974_vm1, %vm975_vm0  ;;  %vm984_vm4 = vweird.f32 %v967_v54 }
 0x431   : > { %v970_v55 = vmul.f32 %v1506_v52, %v969_v53 }
 0x433   : > { %v971_v56 = vmul.f32 0.5, %v970_v55 }
 0x435   : > { %v972_v57 = vsub.f32 1.5, %v971_v56 }
 0x436   : > { %v1508_v58 = vpop.eup %1507 }
 0x437   : > { %v973_v59 = vmul.f32 %v1506_v52, %v972_v57  ;;  %v979_v62 = vmul.f32 %v1508_v58, %v967_v54  ;;  %vm985_vm3 = vweird.f32 %v1508_v58 }
 0x438   : > { %vm986_vm5 = vmor %vm984_vm4, %vm985_vm3 }
 0x439   : > { %v977_v63 = vsel %vm976_vm2, %v1506_v52, %v973_v59  ;;  %v980_v2 = vmul.f32 %v1508_v58, %v979_v62 }
 0x43a   : > { %v990_v1 = vmul.f32 %v988_v60, %v977_v63 }
 0x43b   : > { %v981_v4 = vmul.f32 0.5, %v980_v2 }
 0x43c   : > { %v996_v3 = vmul.f32 %v1503_v61, %v990_v1 }
 0x43d   : > { %v982_v6 = vsub.f32 1.5, %v981_v4 }
 0x43e   : > { %v1002_v5 = vadd.f32 %v1504_v0, %v996_v3 }
 0x43f   : > { %v983_v7 = vmul.f32 %v1508_v58, %v982_v6 }
 0x440   : > { %1004 = vst [vmem:[%s418_s1] sm:$0xff] %v1002_v5 }
 0x441   : > { %v987_v9 = vsel %vm986_vm5, %v1508_v58, %v983_v7 }
 0x442   : > { %v991_v10 = vmul.f32 %v989_v8, %v987_v9 }
 0x444   : > { %v997_v11 = vmul.f32 %v1503_v61, %v991_v10 }
 0x446   : > { %v1003_v12 = vadd.f32 %v1504_v0, %v997_v11 }
 0x448   : > { %1005 = vst [vmem:[%s418_s1 + $0x8] sm:$0xff] %v1003_v12 }
 0x449   : > { %1686 = shalt.err (!%p1683_p10)
}
 0x44a   : > { %s1743_s29 = smov 128   ;;  %s1744_s17 = smov 8  }
 0x44b   : > { %1422 = dma.vmem_to_hbm [thread:$0]  (%p1888_p3), %s1020_s25, 256, %s1022_s24, %s1007_s13, %s1743_s29, %s1743_s29, %s1744_s17  }
 0x44c PF: > { %s1036_s1 = sand.u32 1, %s1721_s30   ;;  %p2019_p12 = scmp.ge.s32.totalorder %s1733_s12, 2 }
 0x44d   : > { %s1037_s15 = scalar_lea.sflag [#allocation4], %s1036_s1 }
 0x44e   : > { %p1442_p13 = pnand %p2019_p12, %p1830_p6 }
 0x450   : > { %p1443_p0 = pneg %p1442_p13 }
 0x452   : > { %1716 = dma.done.wait (%p1443_p0), %s1037_s15, 256  }
 0x453   : > { %1718 = vsyncadd (%p1443_p0), %s1037_s15, 4294967040  ;;  %p24_p5 = scmp.ge.s32.totalorder %s1878_s19, 4   ;;  %s2020_s30 = smov %s1725_s10 }
 0x454   : > { %s2021_s10 = smov %s1729_s11  ;;  %s2022_s11 = smov %s1894_s22 }
 0x455   : > { %s2023_s12 = smov %s1878_s19  ;;  %26 = sbr.rel (!%p24_p5) target bundleno = 11 (0xb), region = 123 }
 0x45a   :  { %1043 = vsyncpa [#allocation3], 1 }
 0x45b   :  { %1045 = vsyncpa [#allocation3 + $0x1], 1 }
 0x45c   :  { %1046 = vsyncpa [#allocation6], 1 }
 0x45d   :  { %1047 = vsyncpa [#allocation9], 1 }
 0x45e   :  { %1048 = vsyncpa [#allocation4], 1 }
 0x45f   :  { %1050 = vsyncpa [#allocation4 + $0x1], 1 }

</bundles_post_ra>
